<compile_context>
chip_gen: v7x
topology: tpu7x:2x2x1
jax: 0.10.0
libtpu: 0.0.40
codegen_flags: <defaults>
</compile_context>

<pallas_src>
import jax
import jax.numpy as jnp
from jax import lax
from jax.experimental import pallas as pl
from jax.experimental.pallas import tpu as pltpu


def _round_up(n, m):
    return ((n + m - 1) // m) * m


# ----------------------------------------------------------------------------
# One-time constants for the fused conv kernel (hoisted out of the forward path).
#   a      : (3*(W+2)*Cin, W*Cout) bf16   banded ("lowered"/row-Toeplitz) conv weight
#   bias_t : (1, W*Cout) f32              bias tiled to match the W*Cout lane layout
#   pool_r : (W*Cout, Cout) f32           lane-pool matrix (folds the W lane groups,
#                                          scaled by 1/(H*W) for the global mean)
# ----------------------------------------------------------------------------
def prepare_conv_constants(w_hwio, bias, H, W):
    Cin, Cout = int(w_hwio.shape[2]), int(w_hwio.shape[3])
    a = jnp.concatenate(
        [
            sum(
                jnp.kron(jnp.eye(W + 2, W, k=-kw, dtype=jnp.float32),
                         w_hwio[kh, kw].astype(jnp.float32))
                for kw in range(3)
            )
            for kh in range(3)
        ],
        axis=0,
    ).astype(jnp.bfloat16)                               # (3*(W+2)*Cin, W*Cout)
    bias_t = jnp.tile(bias.reshape(1, Cout).astype(jnp.float32), (1, W))  # (1, W*Cout)
    pool_r = jnp.tile(jnp.eye(Cout, dtype=jnp.float32), (W, 1)) / float(H * W)
    return {"a": a, "bias_t": bias_t, "pool_r": pool_r}


# ----------------------------------------------------------------------------
# Kernel 1: fused 3x3 same-conv + bias + ReLU + global-average-pool.
#   x_ref : (TB, H, 3*(W+2)*Cin) bf16   im2col'd (over kh) padded rows
#   a_ref : (3*(W+2)*Cin, W*Cout) bf16  merged banded conv weight (single matmul)
#   b_ref : (1, W*Cout) f32             tiled bias
#   p_ref : (W*Cout, Cout) f32          lane-pool matrix
#   o_ref : (TB, Cout) f32              pooled features
# ----------------------------------------------------------------------------
def _conv_gap_kernel(x_ref, a_ref, b_ref, p_ref, o_ref):
    TB, H, K = x_ref.shape
    WCo = a_ref.shape[1]

    # one lane-dense bf16 MXU matmul: M = TB*H, K = 3*(W+2)*Cin, N = W*Cout.
    lhs = x_ref[...].reshape(TB * H, K)
    acc = jnp.dot(lhs, a_ref[...], preferred_element_type=jnp.float32)  # (TB*H, WCo) f32

    y = jnp.maximum(acc + b_ref[...], 0.0)               # bias + ReLU

    # global average pool entirely in VMEM/vregs:
    #   sum over H (sublane reduce) then fold the W lane-groups on the MXU.
    ysum = jnp.sum(y.reshape(TB, H, WCo), axis=1)        # (TB, W*Cout)
    pooled = jnp.dot(ysum, p_ref[...], preferred_element_type=jnp.float32)
    o_ref[...] = pooled.astype(o_ref.dtype)              # (TB, Cout)


def conv3x3_relu_gap(x_nhwc, consts, *, block_n=64):
    """Fused conv3x3(SAME) + bias + ReLU + global-avg-pool -> (N, Cout)."""
    N, H, W, Cin = x_nhwc.shape
    a, bias_t, pool_r = consts["a"], consts["bias_t"], consts["pool_r"]
    K = a.shape[0]                                       # 3*(W+2)*Cin
    WCo = a.shape[1]                                     # W*Cout
    Cout = pool_r.shape[1]

    # TB: multiple of 8, capped by block_n, and small enough that the grid has
    # >= 2 steps whenever possible (so both v7x TensorCores get work).
    TB = max(8, min(block_n, _round_up((N + 1) // 2, 8)))
    N_pad = _round_up(N, TB)

    # halo + batch pad (small, one-time); fold (W+2, Cin) into a lane-dense row and
    # do the kh im2col here so the kernel sees one aligned K=3*(W+2)*Cin operand.
    xp = jnp.pad(x_nhwc, ((0, N_pad - N), (1, 1), (1, 1), (0, 0)))
    xrows = xp.reshape(N_pad, H + 2, (W + 2) * Cin)
    x3 = jnp.concatenate([xrows[:, kh:kh + H, :] for kh in range(3)], axis=-1)
    x3 = x3.astype(jnp.bfloat16)                         # (N_pad, H, K)

    # Explicit scoped-VMEM budget: f32 accumulator + double-buffered operand blocks.
    acc_bytes = TB * H * WCo * 4
    buf_bytes = 2 * (TB * H * K * 2 + K * WCo * 2 + WCo * 4 + WCo * Cout * 4
                     + TB * Cout * 4)
    vmem_limit = int(min(48 * 2**20, max(16 * 2**20, 2 * (acc_bytes + buf_bytes))))

    out = pl.pallas_call(
        _conv_gap_kernel,
        out_shape=jax.ShapeDtypeStruct((N_pad, Cout), jnp.float32),
        grid=(N_pad // TB,),
        in_specs=[
            pl.BlockSpec((TB, H, K), lambda n: (n, 0, 0)),
            pl.BlockSpec((K, WCo), lambda n: (0, 0)),
            pl.BlockSpec((1, WCo), lambda n: (0, 0)),
            pl.BlockSpec((WCo, Cout), lambda n: (0, 0)),
        ],
        out_specs=pl.BlockSpec((TB, Cout), lambda n: (n, 0)),
        compiler_params=pltpu.CompilerParams(
            dimension_semantics=("parallel",),           # independent image blocks
            vmem_limit_bytes=vmem_limit,
        ),
    )(x3, a, bias_t, pool_r)
    return out[:N]


# ----------------------------------------------------------------------------
# Kernel 2: ProtoNet metric head, one episode per grid step (parallel over B).
#   prototypes = (one_hot(support_y)/k_shot)^T @ pooled_support
#   logits     = -(|q|^2 - 2 q@proto^T + |proto|^2)   (Gram form, all f32 / MXU)
# ----------------------------------------------------------------------------
def _proto_metric_kernel(sup_ref, oh_ref, qry_ref, o_ref):
    sup = sup_ref[...]                                   # (1, S, C) f32
    oh = oh_ref[...]                                     # (1, S, NWAY) f32
    qry = qry_ref[...]                                   # (1, Q, C) f32

    protos = jnp.einsum("bsn,bsc->bnc", oh, sup,
                        preferred_element_type=jnp.float32)        # (1, NWAY, C)
    cross = jnp.einsum("bqc,bnc->bqn", qry, protos,
                       preferred_element_type=jnp.float32)         # (1, Q, NWAY)
    qn = jnp.sum(qry * qry, axis=-1, keepdims=True)                # (1, Q, 1)
    pn = jnp.sum(protos * protos, axis=-1)                         # (1, NWAY)
    o_ref[...] = (-(qn - 2.0 * cross + pn[:, None, :])).astype(o_ref.dtype)


def proto_logits(sup_pooled, onehot, qry_pooled):
    B, S, C = sup_pooled.shape
    Q = qry_pooled.shape[1]
    NWAY = onehot.shape[-1]
    return pl.pallas_call(
        _proto_metric_kernel,
        out_shape=jax.ShapeDtypeStruct((B, Q, NWAY), jnp.float32),
        grid=(B,),
        in_specs=[
            pl.BlockSpec((1, S, C), lambda b: (b, 0, 0)),
            pl.BlockSpec((1, S, NWAY), lambda b: (b, 0, 0)),
            pl.BlockSpec((1, Q, C), lambda b: (b, 0, 0)),
        ],
        out_specs=pl.BlockSpec((1, Q, NWAY), lambda b: (b, 0, 0)),
        compiler_params=pltpu.CompilerParams(
            dimension_semantics=("parallel",)            # episodes are independent
        ),
    )(sup_pooled, onehot, qry_pooled)


# ----------------------------------------------------------------------------
# FSLQuery forward (forward_encoding='FCN_R12' -> forward_FCN path, eval mode).
# ----------------------------------------------------------------------------
def fsl_query_forward(params, support_x, support_y, query_x, query_y,
                      *, n_way, k_shot):
    # support_x: (b, s, 3, h, w) NCHW; query_x: (b, q, 3, h, w); query_y unused (eval).
    b, s, c, h, w = support_x.shape
    q = query_x.shape[1]

    # Concatenate support + query -> a single fused conv+GAP pallas_call.
    imgs = jnp.concatenate(
        [support_x.reshape(b * s, c, h, w), query_x.reshape(b * q, c, h, w)], axis=0)
    imgs = jnp.transpose(imgs, (0, 2, 3, 1))             # NCHW -> NHWC

    pooled = conv3x3_relu_gap(imgs, params["conv"])      # (b*s + b*q, Cout)
    cout = pooled.shape[-1]
    sup_pooled = pooled[: b * s].reshape(b, s, cout)
    qry_pooled = pooled[b * s:].reshape(b, q, cout)

    onehot = jax.nn.one_hot(support_y, n_way, dtype=jnp.float32) / float(k_shot)
    logits = proto_logits(sup_pooled, onehot, qry_pooled)          # (b, q, n_way)
    # TODO(synk): training branch (sum of the query head's loss dict) not reproduced;
    # eval mode returns the query output directly.
    return logits


# ----------------------------------------------------------------------------
# Pure-JAX reference for correctness checking (f32 end-to-end).
# ----------------------------------------------------------------------------
def reference_forward(params, support_x, support_y, query_x, query_y,
                      *, n_way, k_shot):
    b, s, c, h, w = support_x.shape
    q = query_x.shape[1]

    def enc_pool(x):
        x = jnp.transpose(x.reshape(-1, c, h, w), (0, 2, 3, 1))
        y = lax.conv_general_dilated(
            x, params["w"], (1, 1), "SAME",
            dimension_numbers=("NHWC", "HWIO", "NHWC"))
        y = jnp.maximum(y + params["b"].reshape(1, 1, 1, -1), 0.0)
        return jnp.mean(y, axis=(1, 2))

    sp = enc_pool(support_x).reshape(b, s, -1)           # (b, s, C)
    qp = enc_pool(query_x).reshape(b, q, -1)             # (b, q, C)
    onehot = jax.nn.one_hot(support_y, n_way, dtype=jnp.float32) / float(k_shot)
    protos = jnp.einsum("bsn,bsc->bnc", onehot, sp)      # (b, n_way, C)
    d2 = jnp.sum((qp[:, :, None, :] - protos[:, None, :, :]) ** 2, axis=-1)
    return -d2


if __name__ == "__main__":
    key = jax.random.PRNGKey(0)
    k_w, k_b, k_s, k_q = jax.random.split(key, 4)

    # Small few-shot episode: b=2 episodes, n_way=2, k_shot=2 -> s=4 support,
    # q=3 queries, RGB 16x16 images, encoder out_channels=32.
    B, N_WAY, K_SHOT, Q = 2, 2, 2, 3
    S = N_WAY * K_SHOT
    CIN, H, W, COUT = 3, 16, 16, 32

    w_hwio = (0.1 * jax.random.normal(k_w, (3, 3, CIN, COUT))).astype(jnp.float32)
    bias = (0.05 * jax.random.normal(k_b, (1, COUT))).astype(jnp.float32)

    # Hoisted once per weight set (not re-built every forward call).
    conv_consts = prepare_conv_constants(w_hwio, bias, H, W)
    params = {"conv": conv_consts, "w": w_hwio, "b": bias}

    support_x = jax.random.normal(k_s, (B, S, CIN, H, W), dtype=jnp.float32)
    query_x = jax.random.normal(k_q, (B, Q, CIN, H, W), dtype=jnp.float32)
    support_y = jnp.tile(jnp.repeat(jnp.arange(N_WAY), K_SHOT)[None], (B, 1))  # (B, S)
    query_y = jnp.tile(jnp.arange(Q)[None] % N_WAY, (B, 1))                    # (B, Q)

    fwd = jax.jit(fsl_query_forward, static_argnames=("n_way", "k_shot"))
    logits = jax.block_until_ready(
        fwd(params, support_x, support_y, query_x, query_y,
            n_way=N_WAY, k_shot=K_SHOT))

    ref = reference_forward(params, support_x, support_y, query_x, query_y,
                            n_way=N_WAY, k_shot=K_SHOT)
    assert logits.shape == (B, Q, N_WAY)
    max_err = float(jnp.max(jnp.abs(logits - ref)))
    # bf16 MXU operands with f32 accumulation -> tolerance loosened slightly vs f32.
    assert jnp.allclose(logits, ref, atol=1e-2, rtol=1e-2), f"max err {max_err}"

    print("KERNEL_OK")
</pallas_src>

<mosaic_0001>
module attributes {stable_mosaic.version = 11 : i64} {
  func.func @_conv_gap_kernel(%arg0: i32, %arg1: memref<8x16x162xbf16, #tpu.memory_space<vmem>>, %arg2: memref<162x512xbf16, #tpu.memory_space<vmem>>, %arg3: memref<1x512xf32, #tpu.memory_space<vmem>>, %arg4: memref<512x32xf32, #tpu.memory_space<vmem>>, %arg5: memref<8x32xf32, #tpu.memory_space<vmem>>) attributes {dimension_semantics = [#tpu.dimension_semantics<parallel>], iteration_bounds = array<i64: 2>, scalar_prefetch = 0 : i64, scratch_operands = 0 : i64, tpu.core_type = #tpu.core_type<tc>, window_params = [{transform_indices = @transform_0, window_bounds = array<i64: 8, 16, 162>}, {pipeline_mode = #tpu.pipeline_mode<synchronous>, transform_indices = @transform_1, window_bounds = array<i64: 162, 512>}, {pipeline_mode = #tpu.pipeline_mode<synchronous>, transform_indices = @transform_2, window_bounds = array<i64: 1, 512>}, {pipeline_mode = #tpu.pipeline_mode<synchronous>, transform_indices = @transform_3, window_bounds = array<i64: 512, 32>}, {transform_indices = @transform_4, window_bounds = array<i64: 8, 32>}]} {
    %c0 = arith.constant 0 : index
    %c0_0 = arith.constant 0 : index
    %c0_1 = arith.constant 0 : index
    %0 = vector.load %arg1[%c0, %c0_0, %c0_1] : memref<8x16x162xbf16, #tpu.memory_space<vmem>>, vector<8x16x162xbf16>
    %1 = vector.shape_cast %0 : vector<8x16x162xbf16> to vector<128x162xbf16>
    %c0_2 = arith.constant 0 : index
    %c0_3 = arith.constant 0 : index
    %2 = vector.load %arg2[%c0_2, %c0_3] : memref<162x512xbf16, #tpu.memory_space<vmem>>, vector<162x512xbf16>
    %cst = arith.constant dense<0.000000e+00> : vector<128x512xf32>
    %3 = tpu.matmul %1, %2, %cst {dimension_numbers = #tpu.dot_dimension_numbers<[1], [0], [0], [1], [0, 0, 1, 1], [], []>} : vector<128x162xbf16>, vector<162x512xbf16>, vector<128x512xf32> -> vector<128x512xf32>
    %c0_4 = arith.constant 0 : index
    %c0_5 = arith.constant 0 : index
    %4 = vector.load %arg3[%c0_4, %c0_5] : memref<1x512xf32, #tpu.memory_space<vmem>>, vector<1x512xf32>
    %5 = vector.broadcast %4 : vector<1x512xf32> to vector<128x512xf32>
    %6 = arith.addf %3, %5 : vector<128x512xf32>
    %cst_6 = arith.constant 0.000000e+00 : f32
    %7 = vector.broadcast %cst_6 : f32 to vector<128x512xf32>
    %8 = arith.maximumf %6, %7 : vector<128x512xf32>
    %9 = vector.shape_cast %8 : vector<128x512xf32> to vector<8x16x512xf32>
    %cst_7 = arith.constant dense<0.000000e+00> : vector<8x512xf32>
    %10 = vector.multi_reduction <add>, %9, %cst_7 [1] : vector<8x16x512xf32> to vector<8x512xf32>
    %c0_8 = arith.constant 0 : index
    %c0_9 = arith.constant 0 : index
    %11 = vector.load %arg4[%c0_8, %c0_9] : memref<512x32xf32, #tpu.memory_space<vmem>>, vector<512x32xf32>
    %cst_10 = arith.constant dense<0.000000e+00> : vector<8x32xf32>
    %12 = tpu.matmul %10, %11, %cst_10 {dimension_numbers = #tpu.dot_dimension_numbers<[1], [0], [0], [1], [0, 0, 1, 1], [], []>} : vector<8x512xf32>, vector<512x32xf32>, vector<8x32xf32> -> vector<8x32xf32>
    %c0_11 = arith.constant 0 : index
    %c0_12 = arith.constant 0 : index
    %13 = vector.load %arg5[%c0_11, %c0_12] : memref<8x32xf32, #tpu.memory_space<vmem>>, vector<8x32xf32>
    tpu.vector_store %arg5[%c0_11, %c0_12], %12 {strides = array<i32>} : memref<8x32xf32, #tpu.memory_space<vmem>>, vector<8x32xf32>,
    return
  }
  func.func @transform_0(%arg0: i32) -> (i32, i32, i32) {
    %c0_i32 = arith.constant 0 : i32
    %c0_i32_0 = arith.constant 0 : i32
    %c0_i32_1 = arith.constant 0 : i32
    return %arg0, %c0_i32, %c0_i32_0 : i32, i32, i32
  }
  func.func @transform_1(%arg0: i32) -> (i32, i32) {
    %c0_i32 = arith.constant 0 : i32
    %c0_i32_0 = arith.constant 0 : i32
    %c0_i32_1 = arith.constant 0 : i32
    return %c0_i32, %c0_i32_0 : i32, i32
  }
  func.func @transform_2(%arg0: i32) -> (i32, i32) {
    %c0_i32 = arith.constant 0 : i32
    %c0_i32_0 = arith.constant 0 : i32
    %c0_i32_1 = arith.constant 0 : i32
    return %c0_i32, %c0_i32_0 : i32, i32
  }
  func.func @transform_3(%arg0: i32) -> (i32, i32) {
    %c0_i32 = arith.constant 0 : i32
    %c0_i32_0 = arith.constant 0 : i32
    %c0_i32_1 = arith.constant 0 : i32
    return %c0_i32, %c0_i32_0 : i32, i32
  }
  func.func @transform_4(%arg0: i32) -> (i32, i32) {
    %c0_i32 = arith.constant 0 : i32
    %c0_i32_0 = arith.constant 0 : i32
    return %arg0, %c0_i32 : i32, i32
  }
}

module attributes {stable_mosaic.version = 11 : i64} {
  func.func @_proto_metric_kernel(%arg0: i32, %arg1: memref<1x4x32xf32, #tpu.memory_space<vmem>>, %arg2: memref<1x4x2xf32, #tpu.memory_space<vmem>>, %arg3: memref<1x3x32xf32, #tpu.memory_space<vmem>>, %arg4: memref<1x3x2xf32, #tpu.memory_space<vmem>>) attributes {dimension_semantics = [#tpu.dimension_semantics<parallel>], iteration_bounds = array<i64: 2>, scalar_prefetch = 0 : i64, scratch_operands = 0 : i64, tpu.core_type = #tpu.core_type<tc>, window_params = [{transform_indices = @transform_0, window_bounds = array<i64: 1, 4, 32>}, {transform_indices = @transform_1, window_bounds = array<i64: 1, 4, 2>}, {transform_indices = @transform_2, window_bounds = array<i64: 1, 3, 32>}, {transform_indices = @transform_3, window_bounds = array<i64: 1, 3, 2>}]} {
    %c0 = arith.constant 0 : index
    %c0_0 = arith.constant 0 : index
    %c0_1 = arith.constant 0 : index
    %0 = vector.load %arg1[%c0, %c0_0, %c0_1] : memref<1x4x32xf32, #tpu.memory_space<vmem>>, vector<1x4x32xf32>
    %c0_2 = arith.constant 0 : index
    %c0_3 = arith.constant 0 : index
    %c0_4 = arith.constant 0 : index
    %1 = vector.load %arg2[%c0_2, %c0_3, %c0_4] : memref<1x4x2xf32, #tpu.memory_space<vmem>>, vector<1x4x2xf32>
    %c0_5 = arith.constant 0 : index
    %c0_6 = arith.constant 0 : index
    %c0_7 = arith.constant 0 : index
    %2 = vector.load %arg3[%c0_5, %c0_6, %c0_7] : memref<1x3x32xf32, #tpu.memory_space<vmem>>, vector<1x3x32xf32>
    "tpu.trace_start"() <{level = 10 : i32, message = "bsn,bsc->bnc"}> : () -> ()
    %cst = arith.constant dense<0.000000e+00> : vector<1x2x32xf32>
    %3 = tpu.matmul %1, %0, %cst {dimension_numbers = #tpu.dot_dimension_numbers<[1], [1], [2], [2], [0, 0, 0, 2, 1, 2], [0], [0]>} : vector<1x4x2xf32>, vector<1x4x32xf32>, vector<1x2x32xf32> -> vector<1x2x32xf32>
    "tpu.trace_stop"() : () -> ()
    "tpu.trace_start"() <{level = 10 : i32, message = "bqc,bnc->bqn"}> : () -> ()
    %cst_8 = arith.constant dense<0.000000e+00> : vector<1x3x2xf32>
    %4 = tpu.matmul %2, %3, %cst_8 {dimension_numbers = #tpu.dot_dimension_numbers<[2], [2], [1], [1], [0, 0, 0, 1, 1, 1], [0], [0]>} : vector<1x3x32xf32>, vector<1x2x32xf32>, vector<1x3x2xf32> -> vector<1x3x2xf32>
    "tpu.trace_stop"() : () -> ()
    %5 = arith.mulf %2, %2 : vector<1x3x32xf32>
    %cst_9 = arith.constant dense<0.000000e+00> : vector<1x3xf32>
    %6 = vector.multi_reduction <add>, %5, %cst_9 [2] : vector<1x3x32xf32> to vector<1x3xf32>
    %7 = vector.shape_cast %6 : vector<1x3xf32> to vector<1x3x1xf32>
    %8 = arith.mulf %3, %3 : vector<1x2x32xf32>
    %cst_10 = arith.constant dense<0.000000e+00> : vector<1x2xf32>
    %9 = vector.multi_reduction <add>, %8, %cst_10 [2] : vector<1x2x32xf32> to vector<1x2xf32>
    %cst_11 = arith.constant 2.000000e+00 : f32
    %10 = vector.broadcast %cst_11 : f32 to vector<1x3x2xf32>
    %11 = arith.mulf %10, %4 : vector<1x3x2xf32>
    %12 = vector.broadcast %7 : vector<1x3x1xf32> to vector<1x3x2xf32>
    %13 = arith.subf %12, %11 : vector<1x3x2xf32>
    %14 = vector.shape_cast %9 : vector<1x2xf32> to vector<1x1x2xf32>
    %15 = vector.broadcast %14 : vector<1x1x2xf32> to vector<1x3x2xf32>
    %16 = arith.addf %13, %15 : vector<1x3x2xf32>
    %cst_12 = arith.constant 0.000000e+00 : f32
    %17 = vector.broadcast %cst_12 : f32 to vector<1x3x2xf32>
    %18 = arith.subf %17, %16 : vector<1x3x2xf32>
    %c0_13 = arith.constant 0 : index
    %c0_14 = arith.constant 0 : index
    %c0_15 = arith.constant 0 : index
    %19 = vector.load %arg4[%c0_13, %c0_14, %c0_15] : memref<1x3x2xf32, #tpu.memory_space<vmem>>, vector<1x3x2xf32>
    tpu.vector_store %arg4[%c0_13, %c0_14, %c0_15], %18 {strides = array<i32>} : memref<1x3x2xf32, #tpu.memory_space<vmem>>, vector<1x3x2xf32>,
    return
  }
  func.func @transform_0(%arg0: i32) -> (i32, i32, i32) {
    %c0_i32 = arith.constant 0 : i32
    %c0_i32_0 = arith.constant 0 : i32
    %c0_i32_1 = arith.constant 0 : i32
    return %arg0, %c0_i32, %c0_i32_0 : i32, i32, i32
  }
  func.func @transform_1(%arg0: i32) -> (i32, i32, i32) {
    %c0_i32 = arith.constant 0 : i32
    %c0_i32_0 = arith.constant 0 : i32
    %c0_i32_1 = arith.constant 0 : i32
    return %arg0, %c0_i32, %c0_i32_0 : i32, i32, i32
  }
  func.func @transform_2(%arg0: i32) -> (i32, i32, i32) {
    %c0_i32 = arith.constant 0 : i32
    %c0_i32_0 = arith.constant 0 : i32
    %c0_i32_1 = arith.constant 0 : i32
    return %arg0, %c0_i32, %c0_i32_0 : i32, i32, i32
  }
  func.func @transform_3(%arg0: i32) -> (i32, i32, i32) {
    %c0_i32 = arith.constant 0 : i32
    %c0_i32_0 = arith.constant 0 : i32
    %c0_i32_1 = arith.constant 0 : i32
    return %arg0, %c0_i32, %c0_i32_0 : i32, i32, i32
  }
}

</mosaic_0001>

<bundles_post_ra>
// kernel: fsl_query_forward.3
= control target key start
LH: loop header
LB: loop body
LE: loop exit
PB: predicated region body
PF: predicated region fallthrough
CT: control target
= control target key end

     0   :  { %s562_s12 = smov 0   ;;  %s591_s0 = inlined_call_operand.vmem [shape: f32[2,4,32], index: 0, kind: input, shape index: {}]   ;;  %s592_s1 = inlined_call_operand.vmem [shape: f32[2,4,2], index: 1, kind: input, shape index: {}]   ;;  %s593_s2 = inlined_call_operand.vmem [shape: f32[2,3,32], index: 2, kind: input, shape index: {}]   ;;  %s594_s3 = inlined_call_operand.vmem [shape: f32[2,3,2], index: 3, kind: output, shape index: {}]  }
   0x1 LB: > { %s493_s13 = sadd.s32 4294967295, %s538_s12   ;;  %p497_p0 = scmp.ge.s32.totalorder %s538_s12, 1  ;;  %s538_s12 = sphi %s562_s12, %s13_s12  }
   0x2   : > { %p154_p1 = scmp.lt.s32.totalorder %s538_s12, 3 }
   0x4   : > { %p155_p2 = pnand %p497_p0, %p154_p1 }
   0x5   : > { %p184_p3 = scmp.lt.s32.totalorder (!%p155_p2), %s493_s13, 1  ;;  %v540_v0 = vmov (!%p155_p2), 0.0   ;;  %vm541_vm0 = vmmov (!%p155_p2), 0   ;;  %vm239_vm1 = vcmask (!%p155_p2), 1043456   ;;  %vm235_vm2 = vcmask (!%p155_p2), 31744  }
   0x6   : > { %158 = sbr.rel (%p155_p2) target bundleno = 582 (0x246), region = 32  ;;  %512 = vmatprep.subr.mxu0 (!%p155_p2), %v540_v0  ;;  %514 = vmatprep.mubr.msk.f32.mxu0 (!%p155_p2), %vm541_vm0, %v540_v0  ;;  %vm391_vm3 = vcmask (!%p155_p2), 256000   ;;  %vm313_vm4 = vcmask (!%p155_p2), 261120   ;;  %vm396_vm5 = vcmask (!%p155_p2), 254976   ;;  %v403_v11 = vlaneseq (!%p155_p2) }
   0x7   : > { %517 = vmatprep.subr.mxu1 (!%p155_p2), %v540_v0  ;;  %519 = vmatprep.mubr.msk.f32.mxu1 (!%p155_p2), %vm541_vm0, %v540_v0  ;;  %vm414_vm6 = vcmask (!%p155_p2), 10240  }
   0x8   : > { %v404_v12 = vand.u32 (!%p155_p2), 127, %v403_v11  ;;  %v406_v13 = vshrl.u32 (!%p155_p2), %v403_v11, 7 }
   0xa   : > { %v407_v14 = vsub.s32 (!%p155_p2), %v404_v12, %v406_v13 }
   0xd   : > { %s596_s13 = smov (!%p184_p3, %s493_s13), 1 }
   0xe   : > { %s570_s14 = sshll.u32 %s596_s13, 2 }
   0xf   : > { %s191_s17 = scalar_lea.vmem %s592_s1, %s570_s14  ;;  %s187_s20 = scalar_lea.vmem %s591_s0, %s570_s14 }
  0x10   : > { %v201_v1 = vld [vmem:[%s191_s17] sm:$0xf]  ;;  %s195_s23 = scalar_lea.vmem %s593_s2, %s570_s14  ;;  %s199_s26 = scalar_lea.vmem %s594_s3, %s570_s14 }
  0x11   : > { %203 = vxpose.xlu0.b32.start.end [1/1] (short) (narrow) %v201_v1, 8  ;;  %v200_v2 = vld [vmem:[%s187_s20] sm:$0xf] }
  0x12   : > { %513 = vmatpush3.msk.msra.mxu0 %vm239_vm1, %v200_v2  ;;  %v202_v4 = vld [vmem:[%s195_s23] sm:$0x7] }
  0x13   : > { %v390_v5 = vmul.f32 %v202_v4, %v202_v4 }
  0x15   : > { %v392_v6 = vsel %vm391_vm3, %v390_v5, 0.0 }
  0x3e   : > { %393 = vadd.xlane.f32.xlu0 %v392_v6 }
  0x91   : > { %v219_v3 = vpop.trf.xlu0 }
  0x92   : > { %515 = vmatmul.mubr.msk.f32.vlgmr.msra.gmra.mrb[0].mxu0 %vm235_vm2, %v219_v3 }
  0xcb   : > { %v394_v15 = vpop.xlane.xlu0 %393 }
 0x165   : > { %v309_v7 = vpop.f32.mrb[0].mxu0 }
 0x166   : > { %v516_v8 = vpop.f32.mrb[1].mxu0  ;;  %518 = vmatpush3.xpose.msk.msra.mxu1 %vm313_vm4, %v309_v7  ;;  %v395_v9 = vmul.f32 %v309_v7, %v309_v7 }
 0x168   : > { %v397_v10 = vsel %vm396_vm5, %v395_v9, 0.0 }
 0x169   : > { %398 = vadd.xlane.f32.xlu1 %v397_v10  ;;  %520 = vmatmul.mubr.msk.f32.vlgmr.msra.gmra.mrb[0].mxu1 %vm313_vm4, %v202_v4 }
 0x1f6   : > { %v399_v16 = vpop.xlane.xlu1 %398 }
 0x1f7   : > { %v408_v20 = vrot.slane %v399_v16, %v407_v14 }
 0x23c   : > { %v386_v17 = vpop.f32.mrb[0].mxu1 }
 0x23d   : > { %v400_v18 = vmul.f32 2.0, %v386_v17  ;;  %v521_v19 = vpop.f32.mrb[1].mxu1 }
 0x23f   : > { %v401_v21 = vsub.f32 %v394_v15, %v400_v18 }
 0x241   : > { %v412_v22 = vadd.f32 %v408_v20, %v401_v21 }
 0x243   : > { %v413_v23 = vsub.f32 0.0, %v412_v22 }
 0x245   : > { %415 = vst.msk [vmem:[%s199_s26] sm:$0x7] %vm414_vm6, %v413_v23 }
 0x246 PF: > { %s13_s12 = sadd.s32 1, %s538_s12  }
 0x247   : > { %p10_p4 = scmp.ge.s32.totalorder %s13_s12, 4  }
 0x249   :  { %12 = sbr.rel (!%p10_p4) target bundleno = 1 (0x1), region = 68 }

// kernel: fsl_query_forward.2
= control target key start
LH: loop header
LB: loop body
LE: loop exit
PB: predicated region body
PF: predicated region fallthrough
CT: control target
= control target key end

     0   :  { %s1799_s15 = smov 0   ;;  %s2413_s0 = inlined_call_operand.vmem [shape: bf16[16,16,162], index: 0, kind: input, shape index: {}]   ;;  %s2414_s1 = inlined_call_operand.vmem [shape: bf16[162,512], index: 1, kind: input, shape index: {}]   ;;  %s2415_s2 = inlined_call_operand.vmem [shape: f32[1,512], index: 2, kind: input, shape index: {}]   ;;  %s2416_s3 = inlined_call_operand.vmem [shape: f32[512,32], index: 3, kind: input, shape index: {}]   ;;  %s2417_s4 = inlined_call_operand.vmem [shape: f32[16,32], index: 4, kind: output, shape index: {}]  }
   0x1 LB: > { %s1805_s16 = sadd.s32 4294967295, %s1772_s15   ;;  %p1450_p0 = scmp.ge.s32.totalorder %s1772_s15, 1  ;;  %s1772_s15 = sphi %s1799_s15, %s14_s15  }
   0x2   : > { %p164_p1 = scmp.lt.s32.totalorder %s1772_s15, 3 }
   0x4   : > { %p165_p2 = pnand %p1450_p0, %p164_p1 }
   0x5   : > { %v1678_v0 = vld [vmem:[%s2414_s1 + $0x4] ss:$16 sps:$4 sm:$0xff] (!%p165_p2)   ;;  %v1680_v1 = vld [vmem:[%s2414_s1 + $0xc] ss:$16 sps:$4 sm:$0xff] (!%p165_p2)   ;;  %v1682_v2 = vld [vmem:[%s2414_s1] ss:$16 sps:$4 sm:$0xff] (!%p165_p2)  }
   0x6   : > { %168 = sbr.rel (%p165_p2) target bundleno = 582 (0x246), region = 36  ;;  %602 = vmatprep.subr.bf16.mxu0 (!%p165_p2), %v1678_v0  ;;  %v1683_v3 = vld [vmem:[%s2414_s1 + $0x8] ss:$16 sps:$4 sm:$0xff] (!%p165_p2)   ;;  %715 = vmatprep.subr.bf16.mxu1 (!%p165_p2), %v1680_v1  ;;  %v1684_v4 = vld [vmem:[%s2414_s1 + $0x24] ss:$16 sps:$4 sm:$0xff] (!%p165_p2)   ;;  %s1451_s23 = sshll.u32 (!%p165_p2), %s1805_s16, 3 }
   0x7   : > { %603 = vmatpush1.bf16.msra.mxu0 (!%p165_p2), %v1682_v2  ;;  %716 = vmatpush1.bf16.msra.mxu1 (!%p165_p2), %v1683_v3  ;;  %v1686_v5 = vld [vmem:[%s2414_s1 + $0x2c] ss:$16 sps:$4 sm:$0xff] (!%p165_p2)   ;;  %v1688_v6 = vld [vmem:[%s2414_s1 + $0x20] ss:$16 sps:$4 sm:$0xff] (!%p165_p2)   ;;  %v1689_v7 = vld [vmem:[%s2414_s1 + $0x28] ss:$16 sps:$4 sm:$0xff] (!%p165_p2)  }
   0x8   : > { %604 = vmatprep.subr.bf16.mxu0 (!%p165_p2), %v1684_v4  ;;  %717 = vmatprep.subr.bf16.mxu1 (!%p165_p2), %v1686_v5  ;;  %v1690_v8 = vld [vmem:[%s2414_s1 + $0x44] ss:$16 sps:$4 sm:$0xff] (!%p165_p2)   ;;  %v1692_v9 = vld [vmem:[%s2414_s1 + $0x4c] ss:$16 sps:$4 sm:$0xff] (!%p165_p2)   ;;  %v1694_v10 = vld [vmem:[%s2414_s1 + $0x40] ss:$16 sps:$4 sm:$0xff] (!%p165_p2)  }
   0x9   : > { %v1695_v11 = vld [vmem:[%s2414_s1 + $0x48] ss:$16 sps:$4 sm:$0xff] (!%p165_p2)   ;;  %v1696_v12 = vld [vmem:[%s2414_s1 + $0x64] ss:$16 sps:$4 sm:$0xff] (!%p165_p2)   ;;  %v1698_v13 = vld [vmem:[%s2414_s1 + $0x6c] ss:$16 sps:$4 sm:$0xff] (!%p165_p2)  }
   0xa   : > { %v1700_v14 = vld [vmem:[%s2414_s1 + $0x60] ss:$16 sps:$4 sm:$0xff] (!%p165_p2)   ;;  %v1701_v15 = vld [vmem:[%s2414_s1 + $0x68] ss:$16 sps:$4 sm:$0xff] (!%p165_p2)   ;;  %v1702_v16 = vld [vmem:[%s2414_s1 + $0x84] ss:$16 sps:$4 sm:$0xff] (!%p165_p2)  }
   0xb   : > { %605 = vmatpush1.bf16.msra.mxu0 (!%p165_p2), %v1688_v6  ;;  %718 = vmatpush1.bf16.msra.mxu1 (!%p165_p2), %v1689_v7  ;;  %v1704_v17 = vld [vmem:[%s2414_s1 + $0x8c] ss:$16 sps:$4 sm:$0xff] (!%p165_p2)   ;;  %p191_p3 = scmp.lt.s32.totalorder (!%p165_p2), %s1451_s23, 15  ;;  %v1706_v18 = vld [vmem:[%s2414_s1 + $0x80] ss:$16 sps:$4 sm:$0xff] (!%p165_p2)   ;;  %vm564_vm0 = vcmask (!%p165_p2), 277504  }
   0xc   : > { %606 = vmatprep.subr.bf16.mxu0 (!%p165_p2), %v1690_v8  ;;  %719 = vmatprep.subr.bf16.mxu1 (!%p165_p2), %v1692_v9  ;;  %v1707_v19 = vld [vmem:[%s2414_s1 + $0x88] ss:$16 sps:$4 sm:$0xff] (!%p165_p2)   ;;  %v1708_v20 = vld [vmem:[%s2414_s1 + $0xa4] ss:$16 sps:$4 sm:$0xff] (!%p165_p2)   ;;  %v1710_v21 = vld [vmem:[%s2414_s1 + $0xac] ss:$16 sps:$4 sm:$0xff] (!%p165_p2)  }
   0xd   : > { %s2419_s23 = smov (!%p191_p3, %s1451_s23), 15  ;;  %v1712_v22 = vld [vmem:[%s2414_s1 + $0xa0] ss:$16 sps:$4 sm:$0xff]   ;;  %v1713_v23 = vld [vmem:[%s2414_s1 + $0xa8] ss:$16 sps:$4 sm:$0xff]   ;;  %vm589_vm1 = vcmask 1040384  }
   0xe   : > { %v1714_v24 = vld [vmem:[%s2414_s1 + $0xc4] ss:$16 sps:$4 sm:$0xff]   ;;  %v1716_v25 = vld [vmem:[%s2414_s1 + $0xcc] ss:$16 sps:$4 sm:$0xff]   ;;  %s1535_s22 = sshll.u32 %s2419_s23, 4  ;;  %vm1212_vm2 = vcmask 1041409  }
   0xf   : > { %607 = vmatpush1.bf16.msra.mxu0 %v1694_v10  ;;  %720 = vmatpush1.bf16.msra.mxu1 %v1695_v11  ;;  %v1718_v26 = vld [vmem:[%s2414_s1 + $0xc0] ss:$16 sps:$4 sm:$0xff]   ;;  %v1719_v27 = vld [vmem:[%s2414_s1 + $0xc8] ss:$16 sps:$4 sm:$0xff]   ;;  %v1720_v28 = vld [vmem:[%s2414_s1 + $0xe4] ss:$16 sps:$4 sm:$0xff]   ;;  %s1903_s7 = scalar_lea.vmem %s2413_s0, %s1535_s22 }
  0x10   : > { %608 = vmatprep.subr.bf16.mxu0 %v1696_v12  ;;  %721 = vmatprep.subr.bf16.mxu1 %v1698_v13  ;;  %v1722_v29 = vld [vmem:[%s2414_s1 + $0xec] ss:$16 sps:$4 sm:$0xff]   ;;  %v1724_v30 = vld [vmem:[%s2414_s1 + $0xe0] ss:$16 sps:$4 sm:$0xff]   ;;  %v1725_v31 = vld [vmem:[%s2414_s1 + $0xe8] ss:$16 sps:$4 sm:$0xff]  }
  0x11   : > { %v1744_v32 = vld [vmem:[%s1903_s7 + $0x4] ss:$8 sps:$4 sm:$0xff]   ;;  %v1730_v35 = vld [vmem:[%s2414_s1 + $0x100] ss:$16 sps:$4 sm:$0xff]   ;;  %v1731_v36 = vld [vmem:[%s2414_s1 + $0x108] ss:$16 sps:$4 sm:$0xff]  }
  0x12   : > { %v1726_v33 = vld [vmem:[%s2414_s1 + $0x104] ss:$16 sps:$4 sm:$0xff]   ;;  %v1728_v34 = vld [vmem:[%s2414_s1 + $0x10c] ss:$16 sps:$4 sm:$0xff]   ;;  %1516 = vmatprep.mubr.msk.bf16.mxu0 %vm564_vm0, %v1744_v32  ;;  %1525 = vmatprep.mubr.msk.bf16.mxu1 %vm564_vm0, %v1744_v32  ;;  %v1736_v41 = vld [vmem:[%s2414_s1 + $0x120] ss:$16 sps:$4 sm:$0xff]  }
  0x13   : > { %609 = vmatpush1.bf16.msra.mxu0 %v1700_v14  ;;  %722 = vmatpush1.bf16.msra.mxu1 %v1701_v15  ;;  %v1732_v37 = vld [vmem:[%s2414_s1 + $0x124] ss:$16 sps:$4 sm:$0xff]   ;;  %v1734_v38 = vld [vmem:[%s2414_s1 + $0x12c] ss:$16 sps:$4 sm:$0xff]   ;;  %v1737_v42 = vld [vmem:[%s2414_s1 + $0x128] ss:$16 sps:$4 sm:$0xff]  }
  0x14   : > { %610 = vmatprep.subr.bf16.mxu0 %v1702_v16  ;;  %723 = vmatprep.subr.bf16.mxu1 %v1704_v17  ;;  %v258_v39 = vld [vmem:[%s2414_s1 + $0x140] sm:$0x11]  ;;  %v259_v40 = vld [vmem:[%s2414_s1 + $0x148] sm:$0x11]  ;;  %v1745_v50 = vld [vmem:[%s1903_s7 + $0x14] ss:$8 sps:$4 sm:$0xff]  }
  0x15   : > { %v1512_v43 = vcombine.high %v258_v39, %v258_v39  ;;  %v1514_v44 = vcombine.high %v259_v40, %v259_v40  ;;  %v1511_v45 = vcombine.low %v258_v39, %v258_v39  ;;  %v1513_v46 = vcombine.low %v259_v40, %v259_v40  ;;  %v1742_v49 = vld [vmem:[%s1903_s7] ss:$8 sps:$4 sm:$0xff]   ;;  %v1747_v51 = vld [vmem:[%s1903_s7 + $0x10] ss:$8 sps:$4 sm:$0xff]   ;;  %v1748_v52 = vld [vmem:[%s1903_s7 + $0x24] ss:$8 sps:$4 sm:$0xff]  }
  0x16   : > { %v1750_v53 = vld [vmem:[%s1903_s7 + $0x20] ss:$8 sps:$4 sm:$0xff]   ;;  %v1751_v54 = vld [vmem:[%s1903_s7 + $0x34] ss:$8 sps:$4 sm:$0xff]   ;;  %v1753_v55 = vld [vmem:[%s1903_s7 + $0x30] ss:$8 sps:$4 sm:$0xff]  }
  0x17   : > { %611 = vmatpush1.bf16.msra.mxu0 %v1706_v18  ;;  %724 = vmatpush1.bf16.msra.mxu1 %v1707_v19  ;;  %v591_v47 = vsel %vm589_vm1, %v1511_v45, 0  ;;  %v597_v48 = vsel %vm589_vm1, %v1513_v46, 0  ;;  %v1754_v56 = vld [vmem:[%s1903_s7 + $0x44] ss:$8 sps:$4 sm:$0xff]   ;;  %v1756_v57 = vld [vmem:[%s1903_s7 + $0x40] ss:$8 sps:$4 sm:$0xff]  }
  0x18   : > { %612 = vmatprep.subr.bf16.mxu0 %v1708_v20  ;;  %725 = vmatprep.subr.bf16.mxu1 %v1710_v21  ;;  %v1757_v58 = vld [vmem:[%s1903_s7 + $0x54] ss:$8 sps:$4 sm:$0xff]   ;;  %v1759_v59 = vld [vmem:[%s1903_s7 + $0x50] ss:$8 sps:$4 sm:$0xff]   ;;  %v1760_v60 = vld [vmem:[%s1903_s7 + $0x64] ss:$8 sps:$4 sm:$0xff]  }
  0x19   : > { %v1762_v61 = vld [vmem:[%s1903_s7 + $0x60] ss:$8 sps:$4 sm:$0xff]   ;;  %v1763_v62 = vld [vmem:[%s1903_s7 + $0x74] ss:$8 sps:$4 sm:$0xff]   ;;  %v1765_v63 = vld [vmem:[%s1903_s7 + $0x70] ss:$8 sps:$4 sm:$0xff]  }
  0x1a   : > { %v1132_v0 = vld [vmem:[%s2416_s3 + $0x80] sm:$0xff]  ;;  %v1133_v1 = vld [vmem:[%s2416_s3 + $0x88] sm:$0xff]  ;;  %v1134_v12 = vld [vmem:[%s2416_s3 + $0x90] sm:$0xff]  ;;  %vm1214_vm3 = vcmask 1042434   ;;  %vm1216_vm4 = vcmask 1043459   ;;  %vm1218_vm5 = vcmask 1044484  }
  0x1b   : > { %613 = vmatpush1.bf16.msra.mxu0 %v1712_v22  ;;  %726 = vmatpush1.bf16.msra.mxu1 %v1713_v23  ;;  %v1164_v2 = vld [vmem:[%s2416_s3 + $0x180] sm:$0xff]  ;;  %v1606_v3 = vpack.c.bf16 %v1133_v1, %v1132_v0  ;;  %v1165_v4 = vld [vmem:[%s2416_s3 + $0x188] sm:$0xff]  ;;  %v1135_v13 = vld [vmem:[%s2416_s3 + $0x98] sm:$0xff]  ;;  %vm1220_vm6 = vcmask 1045509   ;;  %vm1222_vm7 = vcmask 1046534   ;;  %vm1224_vm8 = vcmask 1047559  }
  0x1c   : > { %614 = vmatprep.subr.bf16.mxu0 %v1714_v24  ;;  %727 = vmatprep.subr.bf16.mxu1 %v1716_v25  ;;  %v1116_v5 = vld [vmem:[%s2416_s3] sm:$0xff]  ;;  %v1117_v6 = vld [vmem:[%s2416_s3 + $0x8] sm:$0xff]  ;;  %v1638_v7 = vpack.c.bf16 %v1165_v4, %v1164_v2  ;;  %v1166_v14 = vld [vmem:[%s2416_s3 + $0x190] sm:$0xff]  ;;  %v1610_v15 = vpack.c.bf16 %v1135_v13, %v1134_v12  ;;  %p197_p4 = scmp.lt.s32.totalorder %s1805_s16, 1  ;;  %vm1391_vm9 = vcmask 261120  }
  0x1d   : > { %v1608_v8 = vpack.c.bf16 %v1117_v6, %v1116_v5  ;;  %v1148_v9 = vld [vmem:[%s2416_s3 + $0x100] sm:$0xff]  ;;  %v1149_v10 = vld [vmem:[%s2416_s3 + $0x108] sm:$0xff]  ;;  %v1167_v16 = vld [vmem:[%s2416_s3 + $0x198] sm:$0xff] }
  0x1e   : > { %v1640_v11 = vpack.c.bf16 %v1149_v10, %v1148_v9  ;;  %v1118_v17 = vld [vmem:[%s2416_s3 + $0x10] sm:$0xff]  ;;  %v1119_v18 = vld [vmem:[%s2416_s3 + $0x18] sm:$0xff]  ;;  %v1642_v19 = vpack.c.bf16 %v1167_v16, %v1166_v14  ;;  %v1136_v24 = vld [vmem:[%s2416_s3 + $0xa0] sm:$0xff]  ;;  %s2421_s16 = smov (!%p197_p4, %s1805_s16), 1 }
  0x1f   : > { %615 = vmatpush1.bf16.msra.mxu0 %v1718_v26  ;;  %728 = vmatpush1.bf16.msra.mxu1 %v1719_v27  ;;  %v1612_v20 = vpack.c.bf16 %v1119_v18, %v1118_v17  ;;  %v1150_v21 = vld [vmem:[%s2416_s3 + $0x110] sm:$0xff]  ;;  %v1151_v22 = vld [vmem:[%s2416_s3 + $0x118] sm:$0xff]  ;;  %v1137_v25 = vld [vmem:[%s2416_s3 + $0xa8] sm:$0xff]  ;;  %s1454_s20 = sshll.u32 %s2421_s16, 3 }
  0x20   : > { %616 = vmatprep.subr.bf16.mxu0 %v1720_v28  ;;  %729 = vmatprep.subr.bf16.mxu1 %v1722_v29  ;;  %v1644_v23 = vpack.c.bf16 %v1151_v22, %v1150_v21  ;;  %v1168_v26 = vld [vmem:[%s2416_s3 + $0x1a0] sm:$0xff]  ;;  %v1614_v27 = vpack.c.bf16 %v1137_v25, %v1136_v24  ;;  %v1169_v28 = vld [vmem:[%s2416_s3 + $0x1a8] sm:$0xff]  ;;  %v1171_v40 = vld [vmem:[%s2416_s3 + $0x1b8] sm:$0xff]  ;;  %s200_s24 = scalar_lea.vmem %s2417_s4, %s1454_s20 }
  0x21   : > { %v1120_v29 = vld [vmem:[%s2416_s3 + $0x20] sm:$0xff]  ;;  %v1154_v45 = vld [vmem:[%s2416_s3 + $0x130] sm:$0xff]  ;;  %v1155_v46 = vld [vmem:[%s2416_s3 + $0x138] sm:$0xff] }
  0x22   : > { %v1175_v0 = vld [vmem:[%s2416_s3 + $0x1d8] sm:$0xff]  ;;  %v1126_v2 = vld [vmem:[%s2416_s3 + $0x50] sm:$0xff]  ;;  %v1145_v9 = vld [vmem:[%s2416_s3 + $0xe8] sm:$0xff] }
  0x23   : > { %617 = vmatpush1.bf16.msra.mxu0 %v1724_v30  ;;  %730 = vmatpush1.bf16.msra.mxu1 %v1725_v31  ;;  %v1121_v30 = vld [vmem:[%s2416_s3 + $0x28] sm:$0xff]  ;;  %v1646_v31 = vpack.c.bf16 %v1169_v28, %v1168_v26  ;;  %v1158_v4 = vld [vmem:[%s2416_s3 + $0x150] sm:$0xff]  ;;  %v1159_v6 = vld [vmem:[%s2416_s3 + $0x158] sm:$0xff] }
  0x24   : > { %618 = vmatprep.subr.bf16.mxu0 %v1726_v33  ;;  %731 = vmatprep.subr.bf16.mxu1 %v1728_v34  ;;  %v1616_v32 = vpack.c.bf16 %v1121_v30, %v1120_v29  ;;  %v1152_v33 = vld [vmem:[%s2416_s3 + $0x120] sm:$0xff]  ;;  %v1153_v34 = vld [vmem:[%s2416_s3 + $0x128] sm:$0xff]  ;;  %v1147_v21 = vld [vmem:[%s2416_s3 + $0xf8] sm:$0xff] }
  0x25   : > { %v1176_v10 = vld [vmem:[%s2416_s3 + $0x1e0] sm:$0xff]  ;;  %v1177_v12 = vld [vmem:[%s2416_s3 + $0x1e8] sm:$0xff]  ;;  %v1178_v22 = vld [vmem:[%s2416_s3 + $0x1f0] sm:$0xff] }
  0x26   : > { %v1128_v13 = vld [vmem:[%s2416_s3 + $0x60] sm:$0xff]  ;;  %v1129_v14 = vld [vmem:[%s2416_s3 + $0x68] sm:$0xff]  ;;  %v1179_v24 = vld [vmem:[%s2416_s3 + $0x1f8] sm:$0xff] }
  0x27   : > { %619 = vmatpush1.bf16.msra.mxu0 %v1730_v35  ;;  %732 = vmatpush1.bf16.msra.mxu1 %v1731_v36  ;;  %v1648_v35 = vpack.c.bf16 %v1153_v34, %v1152_v33  ;;  %v1138_v36 = vld [vmem:[%s2416_s3 + $0xb0] sm:$0xff]  ;;  %v1632_v16 = vpack.c.bf16 %v1129_v14, %v1128_v13  ;;  %v1160_v17 = vld [vmem:[%s2416_s3 + $0x160] sm:$0xff]  ;;  %v1161_v18 = vld [vmem:[%s2416_s3 + $0x168] sm:$0xff] }
  0x28   : > { %620 = vmatprep.subr.bf16.mxu0 %v1732_v37  ;;  %733 = vmatprep.subr.bf16.mxu1 %v1734_v38  ;;  %v1139_v37 = vld [vmem:[%s2416_s3 + $0xb8] sm:$0xff]  ;;  %v1170_v38 = vld [vmem:[%s2416_s3 + $0x1b0] sm:$0xff] }
  0x29   : > { %v1618_v39 = vpack.c.bf16 %v1139_v37, %v1138_v36  ;;  %v1130_v25 = vld [vmem:[%s2416_s3 + $0x70] sm:$0xff]  ;;  %v1131_v26 = vld [vmem:[%s2416_s3 + $0x78] sm:$0xff]  ;;  %v260_v36 = vld [vmem:[%s2415_s2] sm:$0xf] }
  0x2a   : > { %v1636_v28 = vpack.c.bf16 %v1131_v26, %v1130_v25  ;;  %v1162_v29 = vld [vmem:[%s2416_s3 + $0x170] sm:$0xff]  ;;  %v1163_v30 = vld [vmem:[%s2416_s3 + $0x178] sm:$0xff] }
  0x2b   : > { %621 = vmatpush1.bf16.msra.mxu0 %v1736_v41  ;;  %734 = vmatpush1.bf16.msra.mxu1 %v1737_v42  ;;  %v1122_v41 = vld [vmem:[%s2416_s3 + $0x30] sm:$0xff]  ;;  %v1123_v42 = vld [vmem:[%s2416_s3 + $0x38] sm:$0xff] }
  0x2c   : > { %1515 = vmatprep.subr.msk.bf16.mxu0 %vm589_vm1, %v1512_v43  ;;  %1524 = vmatprep.subr.msk.bf16.mxu1 %vm589_vm1, %v1514_v44  ;;  %v1650_v43 = vpack.c.bf16 %v1171_v40, %v1170_v38  ;;  %v1620_v44 = vpack.c.bf16 %v1123_v42, %v1122_v41 }
  0x2f   : > { %623 = vmatpush1.bf16.msra.mxu0 %v591_v47  ;;  %736 = vmatpush1.bf16.msra.mxu1 %v597_v48  ;;  %v1652_v47 = vpack.c.bf16 %v1155_v46, %v1154_v45  ;;  %v1140_v48 = vld [vmem:[%s2416_s3 + $0xc0] sm:$0xff] }
  0x30   : > { %1607 = vmatprep.subr.bf16.mxu0 %v1606_v3  ;;  %1639 = vmatprep.subr.bf16.mxu1 %v1638_v7  ;;  %v1127_v3 = vld [vmem:[%s2416_s3 + $0x58] sm:$0xff]  ;;  %v1660_v7 = vpack.c.bf16 %v1159_v6, %v1158_v4 }
  0x31   : > { %v1628_v5 = vpack.c.bf16 %v1127_v3, %v1126_v2 }
  0x32   : > { %635 = vmatmul.mubr.bf16.vlgmr.msra.gmra.mrb[0].mxu0 %v1742_v49  ;;  %748 = vmatmul.mubr.bf16.vlgmr.msra.gmra.mrb[0].mxu1 %v1742_v49  ;;  %v1141_v49 = vld [vmem:[%s2416_s3 + $0xc8] sm:$0xff] }
  0x33   : > { %1517 = vmatprep.mubr.msk.bf16.mxu0 %vm564_vm0, %v1745_v50  ;;  %1526 = vmatprep.mubr.msk.bf16.mxu1 %vm564_vm0, %v1745_v50  ;;  %v1172_v50 = vld [vmem:[%s2416_s3 + $0x1c0] sm:$0xff] }
  0x34   : > { %1609 = vmatpush3.bf16.msra.mxu0 %v1608_v8  ;;  %1641 = vmatpush3.bf16.msra.mxu1 %v1640_v11  ;;  %v1144_v8 = vld [vmem:[%s2416_s3 + $0xe0] sm:$0xff] }
  0x35   : > { %1611 = vmatprep.subr.bf16.mxu0 %v1610_v15  ;;  %1643 = vmatprep.subr.bf16.mxu1 %v1642_v19  ;;  %v1630_v11 = vpack.c.bf16 %v1145_v9, %v1144_v8  ;;  %v1662_v15 = vpack.c.bf16 %v1177_v12, %v1176_v10  ;;  %v1664_v19 = vpack.c.bf16 %v1161_v18, %v1160_v17 }
  0x38   : > { %1613 = vmatpush3.bf16.msra.mxu0 %v1612_v20  ;;  %1645 = vmatpush3.bf16.msra.mxu1 %v1644_v23  ;;  %v1146_v20 = vld [vmem:[%s2416_s3 + $0xf0] sm:$0xff] }
  0x39   : > { %1615 = vmatprep.subr.bf16.mxu0 %v1614_v27  ;;  %1647 = vmatprep.subr.bf16.mxu1 %v1646_v31  ;;  %v1634_v23 = vpack.c.bf16 %v1147_v21, %v1146_v20  ;;  %v1666_v27 = vpack.c.bf16 %v1179_v24, %v1178_v22  ;;  %v1668_v31 = vpack.c.bf16 %v1163_v30, %v1162_v29 }
  0x3a   : > { %645 = vmatmul.mubr.bf16.gmra.mrb[4].mxu0 %v1747_v51  ;;  %758 = vmatmul.mubr.bf16.gmra.mrb[4].mxu1 %v1747_v51  ;;  %v1622_v51 = vpack.c.bf16 %v1141_v49, %v1140_v48 }
  0x3b   : > { %1518 = vmatprep.mubr.msk.bf16.mxu0 %vm564_vm0, %v1748_v52  ;;  %1527 = vmatprep.mubr.msk.bf16.mxu1 %vm564_vm0, %v1748_v52  ;;  %v1173_v52 = vld [vmem:[%s2416_s3 + $0x1c8] sm:$0xff] }
  0x3c   : > { %1617 = vmatpush3.bf16.msra.mxu0 %v1616_v32  ;;  %1649 = vmatpush3.bf16.msra.mxu1 %v1648_v35  ;;  %v262_v32 = vlaneseq }
  0x3d   : > { %1619 = vmatprep.subr.bf16.mxu0 %v1618_v39  ;;  %1651 = vmatprep.subr.bf16.mxu1 %v1650_v43 }
  0x3e   : > { %v263_v33 = vshrl.u32 %v262_v32, 7 }
  0x40   : > { %1621 = vmatpush3.bf16.msra.mxu0 %v1620_v44  ;;  %1653 = vmatpush3.bf16.msra.mxu1 %v1652_v47  ;;  %v264_v34 = vsub.s32 0, %v263_v33  ;;  %v272_v35 = vsub.s32 2, %v263_v33  ;;  %v268_v37 = vsub.s32 1, %v263_v33  ;;  %v276_v38 = vsub.s32 3, %v263_v33 }
  0x41   : > { %1623 = vmatprep.subr.bf16.mxu0 %v1622_v51 }
  0x42   : > { %655 = vmatmul.mubr.bf16.gmra.mrb[8].mxu0 %v1750_v53  ;;  %768 = vmatmul.mubr.bf16.gmra.mrb[8].mxu1 %v1750_v53  ;;  %v1124_v53 = vld [vmem:[%s2416_s3 + $0x40] sm:$0xff]  ;;  %v2168_v39 = vrot.slane %v260_v36, %v264_v34  ;;  %v2170_v40 = vrot.slane %v260_v36, %v272_v35  ;;  %v2172_v41 = vrot.slane %v260_v36, %v268_v37 }
  0x43   : > { %1519 = vmatprep.mubr.msk.bf16.mxu0 %vm564_vm0, %v1751_v54  ;;  %1528 = vmatprep.mubr.msk.bf16.mxu1 %vm564_vm0, %v1751_v54  ;;  %v1125_v54 = vld [vmem:[%s2416_s3 + $0x48] sm:$0xff]  ;;  %v2174_v42 = vrot.slane %v260_v36, %v276_v38 }
  0x4a   : > { %665 = vmatmul.mubr.bf16.gmra.mrb[12].mxu0 %v1753_v55  ;;  %778 = vmatmul.mubr.bf16.gmra.mrb[12].mxu1 %v1753_v55  ;;  %v1654_v55 = vpack.c.bf16 %v1173_v52, %v1172_v50 }
  0x4b   : > { %1520 = vmatprep.mubr.msk.bf16.mxu0 %vm564_vm0, %v1754_v56  ;;  %1529 = vmatprep.mubr.msk.bf16.mxu1 %vm564_vm0, %v1754_v56  ;;  %v1624_v56 = vpack.c.bf16 %v1125_v54, %v1124_v53 }
  0x4c   : > { %1655 = vmatprep.subr.bf16.mxu1 %v1654_v55 }
  0x4d   : > { %1625 = vmatpush3.bf16.msra.mxu0 %v1624_v56 }
  0x52   : > { %675 = vmatmul.mubr.bf16.gmra.mrb[16].mxu0 %v1756_v57  ;;  %788 = vmatmul.mubr.bf16.gmra.mrb[16].mxu1 %v1756_v57  ;;  %v1156_v57 = vld [vmem:[%s2416_s3 + $0x140] sm:$0xff] }
  0x53   : > { %1521 = vmatprep.mubr.msk.bf16.mxu0 %vm564_vm0, %v1757_v58  ;;  %1530 = vmatprep.mubr.msk.bf16.mxu1 %vm564_vm0, %v1757_v58  ;;  %v1157_v58 = vld [vmem:[%s2416_s3 + $0x148] sm:$0xff] }
  0x5a   : > { %685 = vmatmul.mubr.bf16.gmra.mrb[20].mxu0 %v1759_v59  ;;  %798 = vmatmul.mubr.bf16.gmra.mrb[20].mxu1 %v1759_v59  ;;  %v1656_v59 = vpack.c.bf16 %v1157_v58, %v1156_v57 }
  0x5b   : > { %1522 = vmatprep.mubr.msk.bf16.mxu0 %vm564_vm0, %v1760_v60  ;;  %1531 = vmatprep.mubr.msk.bf16.mxu1 %vm564_vm0, %v1760_v60  ;;  %v1142_v60 = vld [vmem:[%s2416_s3 + $0xd0] sm:$0xff] }
  0x5c   : > { %1657 = vmatpush3.bf16.msra.mxu1 %v1656_v59 }
  0x62   : > { %695 = vmatmul.mubr.bf16.gmra.mrb[24].mxu0 %v1762_v61  ;;  %808 = vmatmul.mubr.bf16.gmra.mrb[24].mxu1 %v1762_v61  ;;  %v1143_v61 = vld [vmem:[%s2416_s3 + $0xd8] sm:$0xff] }
  0x63   : > { %1523 = vmatprep.mubr.msk.bf16.mxu0 %vm564_vm0, %v1763_v62  ;;  %1532 = vmatprep.mubr.msk.bf16.mxu1 %vm564_vm0, %v1763_v62  ;;  %v1174_v62 = vld [vmem:[%s2416_s3 + $0x1d0] sm:$0xff] }
  0x64   : > { %v1658_v1 = vpack.c.bf16 %v1175_v0, %v1174_v62 }
  0x66   : > { %1659 = vmatprep.subr.bf16.mxu1 %v1658_v1 }
  0x67   : > { %1661 = vmatpush3.bf16.msra.mxu1 %v1660_v7 }
  0x68   : > { %1663 = vmatprep.subr.bf16.mxu1 %v1662_v15 }
  0x6a   : > { %705 = vmatmul.mubr.bf16.gmra.mrb[28].mxu0 %v1765_v63  ;;  %818 = vmatmul.mubr.bf16.gmra.mrb[28].mxu1 %v1765_v63  ;;  %v1626_v63 = vpack.c.bf16 %v1143_v61, %v1142_v60 }
  0x6b   : > { %1665 = vmatpush3.bf16.msra.mxu1 %v1664_v19 }
  0x6c   : > { %1627 = vmatprep.subr.bf16.mxu0 %v1626_v63  ;;  %1667 = vmatprep.subr.bf16.mxu1 %v1666_v27 }
  0x6d   : > { %1629 = vmatpush3.bf16.msra.mxu0 %v1628_v5 }
  0x6e   : > { %1631 = vmatprep.subr.bf16.mxu0 %v1630_v11 }
  0x6f   : > { %1669 = vmatpush3.bf16.msra.mxu1 %v1668_v31 }
  0x71   : > { %1633 = vmatpush3.bf16.msra.mxu0 %v1632_v16 }
  0x72   : > { %1635 = vmatprep.subr.bf16.mxu0 %v1634_v23 }
  0x75   : > { %1637 = vmatpush3.bf16.msra.mxu0 %v1636_v28 }
 0x105   : > { %v636_v43 = vpop.f32.mrb[0].mxu0  ;;  %v749_v44 = vpop.f32.mrb[0].mxu1 }
 0x106   : > { %v637_v45 = vadd.f32 %v636_v43, %v2168_v39  ;;  %v750_v46 = vadd.f32 %v749_v44, %v2170_v40  ;;  %v638_v47 = vpop.f32.mrb[1].mxu0  ;;  %v751_v48 = vpop.f32.mrb[1].mxu1 }
 0x107   : > { %v639_v49 = vadd.f32 %v638_v47, %v2172_v41  ;;  %v752_v50 = vadd.f32 %v751_v48, %v2174_v42  ;;  %v640_v51 = vpop.f32.mrb[2].mxu0  ;;  %v753_v52 = vpop.f32.mrb[2].mxu1 }
 0x108   : > { %v641_v53 = vadd.f32 %v640_v51, %v2168_v39  ;;  %v754_v54 = vadd.f32 %v753_v52, %v2170_v40  ;;  %v642_v55 = vpop.f32.mrb[3].mxu0  ;;  %v755_v56 = vpop.f32.mrb[3].mxu1  ;;  %v828_v59 = vmax.f32 %v637_v45, 0.0  ;;  %v830_v60 = vmax.f32 %v750_v46, 0.0 }
 0x109   : > { %v643_v57 = vadd.f32 %v642_v55, %v2172_v41  ;;  %v756_v58 = vadd.f32 %v755_v56, %v2174_v42  ;;  %v829_v63 = vmax.f32 %v639_v49, 0.0  ;;  %v831_v0 = vmax.f32 %v752_v50, 0.0 }
 0x10a   : > { %v832_v61 = vmax.f32 %v641_v53, 0.0  ;;  %v834_v62 = vmax.f32 %v754_v54, 0.0 }
 0x10b   : > { %v833_v1 = vmax.f32 %v643_v57, 0.0  ;;  %v835_v2 = vmax.f32 %v756_v58, 0.0 }
 0x10c   : > { %v892_v3 = vadd.f32 %v832_v61, %v828_v59  ;;  %v906_v4 = vadd.f32 %v834_v62, %v830_v60 }
 0x10d   : > { %v899_v5 = vadd.f32 %v833_v1, %v829_v63  ;;  %v913_v6 = vadd.f32 %v835_v2, %v831_v0  ;;  %v646_v7 = vpop.f32.mrb[4].mxu0  ;;  %v759_v8 = vpop.f32.mrb[4].mxu1 }
 0x10e   : > { %v893_v9 = vrot.slane %v892_v3, 4  ;;  %v907_v10 = vrot.slane %v906_v4, 4  ;;  %v647_v11 = vadd.f32 %v646_v7, %v2168_v39  ;;  %v760_v12 = vadd.f32 %v759_v8, %v2170_v40  ;;  %v648_v13 = vpop.f32.mrb[5].mxu0  ;;  %v761_v14 = vpop.f32.mrb[5].mxu1 }
 0x10f   : > { %v900_v15 = vrot.slane %v899_v5, 4  ;;  %v914_v16 = vrot.slane %v913_v6, 4  ;;  %v649_v17 = vadd.f32 %v648_v13, %v2172_v41  ;;  %v762_v18 = vadd.f32 %v761_v14, %v2174_v42  ;;  %v650_v19 = vpop.f32.mrb[6].mxu0  ;;  %v763_v20 = vpop.f32.mrb[6].mxu1 }
 0x110   : > { %v894_v21 = vadd.f32 %v893_v9, %v892_v3  ;;  %v908_v22 = vadd.f32 %v907_v10, %v906_v4  ;;  %v836_v23 = vmax.f32 %v647_v11, 0.0  ;;  %v838_v24 = vmax.f32 %v760_v12, 0.0  ;;  %v652_v25 = vpop.f32.mrb[7].mxu0  ;;  %v765_v26 = vpop.f32.mrb[7].mxu1 }
 0x111   : > { %v901_v27 = vadd.f32 %v900_v15, %v899_v5  ;;  %v915_v28 = vadd.f32 %v914_v16, %v913_v6  ;;  %v837_v29 = vmax.f32 %v649_v17, 0.0  ;;  %v839_v30 = vmax.f32 %v762_v18, 0.0 }
 0x112   : > { %v895_v31 = vrot.slane %v894_v21, 2  ;;  %v909_v32 = vrot.slane %v908_v22, 2  ;;  %v651_v33 = vadd.f32 %v650_v19, %v2168_v39  ;;  %v764_v34 = vadd.f32 %v763_v20, %v2170_v40 }
 0x113   : > { %v902_v35 = vrot.slane %v901_v27, 2  ;;  %v916_v36 = vrot.slane %v915_v28, 2  ;;  %v653_v37 = vadd.f32 %v652_v25, %v2172_v41  ;;  %v766_v38 = vadd.f32 %v765_v26, %v2174_v42 }
 0x114   : > { %v896_v43 = vadd.f32 %v895_v31, %v894_v21  ;;  %v910_v44 = vadd.f32 %v909_v32, %v908_v22  ;;  %v840_v45 = vmax.f32 %v651_v33, 0.0  ;;  %v842_v46 = vmax.f32 %v764_v34, 0.0 }
 0x115   : > { %v903_v47 = vadd.f32 %v902_v35, %v901_v27  ;;  %v917_v48 = vadd.f32 %v916_v36, %v915_v28  ;;  %v841_v49 = vmax.f32 %v653_v37, 0.0  ;;  %v843_v50 = vmax.f32 %v766_v38, 0.0  ;;  %v656_v51 = vpop.f32.mrb[8].mxu0  ;;  %v769_v52 = vpop.f32.mrb[8].mxu1 }
 0x116   : > { %v897_v53 = vrot.slane %v896_v43, 1  ;;  %v911_v54 = vrot.slane %v910_v44, 1  ;;  %v920_v55 = vadd.f32 %v840_v45, %v836_v23  ;;  %v934_v56 = vadd.f32 %v842_v46, %v838_v24  ;;  %v658_v57 = vpop.f32.mrb[9].mxu0  ;;  %v771_v58 = vpop.f32.mrb[9].mxu1 }
 0x117   : > { %v904_v59 = vrot.slane %v903_v47, 1  ;;  %v918_v60 = vrot.slane %v917_v48, 1  ;;  %v927_v61 = vadd.f32 %v841_v49, %v837_v29  ;;  %v941_v62 = vadd.f32 %v843_v50, %v839_v30  ;;  %v660_v63 = vpop.f32.mrb[10].mxu0  ;;  %v773_v0 = vpop.f32.mrb[10].mxu1 }
 0x118   : > { %v898_v1 = vadd.f32 %v897_v53, %v896_v43  ;;  %v912_v2 = vadd.f32 %v911_v54, %v910_v44  ;;  %v921_v3 = vrot.slane %v920_v55, 4  ;;  %v935_v4 = vrot.slane %v934_v56, 4  ;;  %v662_v5 = vpop.f32.mrb[11].mxu0  ;;  %v775_v6 = vpop.f32.mrb[11].mxu1 }
 0x119   : > { %v905_v7 = vadd.f32 %v904_v59, %v903_v47  ;;  %v919_v8 = vadd.f32 %v918_v60, %v917_v48  ;;  %v928_v9 = vrot.slane %v927_v61, 4  ;;  %v942_v10 = vrot.slane %v941_v62, 4 }
 0x11a   : > { %v922_v11 = vadd.f32 %v921_v3, %v920_v55  ;;  %v936_v12 = vadd.f32 %v935_v4, %v934_v56  ;;  %v657_v13 = vadd.f32 %v656_v51, %v2168_v39  ;;  %v770_v14 = vadd.f32 %v769_v52, %v2170_v40 }
 0x11b   : > { %v929_v15 = vadd.f32 %v928_v9, %v927_v61  ;;  %v943_v16 = vadd.f32 %v942_v10, %v941_v62  ;;  %v659_v17 = vadd.f32 %v658_v57, %v2172_v41  ;;  %v772_v18 = vadd.f32 %v771_v58, %v2174_v42 }
 0x11c   : > { %v923_v19 = vrot.slane %v922_v11, 2  ;;  %v937_v20 = vrot.slane %v936_v12, 2  ;;  %v844_v21 = vmax.f32 %v657_v13, 0.0  ;;  %v846_v22 = vmax.f32 %v770_v14, 0.0 }
 0x11d   : > { %v930_v23 = vrot.slane %v929_v15, 2  ;;  %v944_v24 = vrot.slane %v943_v16, 2  ;;  %v845_v25 = vmax.f32 %v659_v17, 0.0  ;;  %v847_v26 = vmax.f32 %v772_v18, 0.0  ;;  %v666_v27 = vpop.f32.mrb[12].mxu0  ;;  %v779_v28 = vpop.f32.mrb[12].mxu1 }
 0x11e   : > { %v924_v29 = vadd.f32 %v923_v19, %v922_v11  ;;  %v938_v30 = vadd.f32 %v937_v20, %v936_v12  ;;  %v661_v31 = vadd.f32 %v660_v63, %v2168_v39  ;;  %v774_v32 = vadd.f32 %v773_v0, %v2170_v40  ;;  %v668_v33 = vpop.f32.mrb[13].mxu0  ;;  %v781_v34 = vpop.f32.mrb[13].mxu1 }
 0x11f   : > { %v931_v35 = vadd.f32 %v930_v23, %v929_v15  ;;  %v945_v36 = vadd.f32 %v944_v24, %v943_v16  ;;  %v663_v37 = vadd.f32 %v662_v5, %v2172_v41  ;;  %v776_v38 = vadd.f32 %v775_v6, %v2174_v42  ;;  %v670_v43 = vpop.f32.mrb[14].mxu0  ;;  %v783_v44 = vpop.f32.mrb[14].mxu1 }
 0x120   : > { %v925_v45 = vrot.slane %v924_v29, 1  ;;  %v939_v46 = vrot.slane %v938_v30, 1  ;;  %v848_v47 = vmax.f32 %v661_v31, 0.0  ;;  %v850_v48 = vmax.f32 %v774_v32, 0.0  ;;  %v672_v49 = vpop.f32.mrb[15].mxu0  ;;  %v785_v50 = vpop.f32.mrb[15].mxu1 }
 0x121   : > { %v932_v51 = vrot.slane %v931_v35, 1  ;;  %v946_v52 = vrot.slane %v945_v36, 1  ;;  %v849_v53 = vmax.f32 %v663_v37, 0.0  ;;  %v851_v54 = vmax.f32 %v776_v38, 0.0 }
 0x122   : > { %v926_v55 = vadd.f32 %v925_v45, %v924_v29  ;;  %v940_v56 = vadd.f32 %v939_v46, %v938_v30  ;;  %v948_v57 = vadd.f32 %v848_v47, %v844_v21  ;;  %v962_v58 = vadd.f32 %v850_v48, %v846_v22 }
 0x123   : > { %v933_v59 = vadd.f32 %v932_v51, %v931_v35  ;;  %v947_v60 = vadd.f32 %v946_v52, %v945_v36  ;;  %v955_v61 = vadd.f32 %v849_v53, %v845_v25  ;;  %v969_v62 = vadd.f32 %v851_v54, %v847_v26 }
 0x124   : > { %v2201_v63 = vsel %vm1212_vm2, %v926_v55, %v898_v1  ;;  %v2204_v0 = vsel %vm1212_vm2, %v940_v56, %v912_v2  ;;  %v949_v3 = vrot.slane %v948_v57, 4  ;;  %v963_v4 = vrot.slane %v962_v58, 4 }
 0x125   : > { %v2207_v5 = vsel %vm1212_vm2, %v933_v59, %v905_v7  ;;  %v2210_v6 = vsel %vm1212_vm2, %v947_v60, %v919_v8  ;;  %v956_v9 = vrot.slane %v955_v61, 4  ;;  %v970_v10 = vrot.slane %v969_v62, 4  ;;  %v2212_v11 = vpop.f32.mrb[16].mxu0  ;;  %v2214_v12 = vpop.f32.mrb[16].mxu1 }
 0x126   : > { %v950_v1 = vadd.f32 %v949_v3, %v948_v57  ;;  %v964_v13 = vadd.f32 %v963_v4, %v962_v58  ;;  %v667_v2 = vadd.f32 %v666_v27, %v2168_v39  ;;  %v780_v14 = vadd.f32 %v779_v28, %v2170_v40  ;;  %v678_v15 = vpop.f32.mrb[17].mxu0  ;;  %v791_v16 = vpop.f32.mrb[17].mxu1 }
 0x127   : > { %v957_v7 = vadd.f32 %v956_v9, %v955_v61  ;;  %v971_v17 = vadd.f32 %v970_v10, %v969_v62  ;;  %v669_v8 = vadd.f32 %v668_v33, %v2172_v41  ;;  %v782_v18 = vadd.f32 %v781_v34, %v2174_v42  ;;  %v2220_v19 = vpop.f32.mrb[18].mxu0  ;;  %v2222_v20 = vpop.f32.mrb[18].mxu1 }
 0x128   : > { %v951_v21 = vrot.slane %v950_v1, 2  ;;  %v965_v22 = vrot.slane %v964_v13, 2  ;;  %v852_v23 = vmax.f32 %v667_v2, 0.0  ;;  %v854_v24 = vmax.f32 %v780_v14, 0.0  ;;  %v2224_v25 = vpop.f32.mrb[19].mxu0  ;;  %v2226_v26 = vpop.f32.mrb[19].mxu1 }
 0x129   : > { %v958_v27 = vrot.slane %v957_v7, 2  ;;  %v972_v28 = vrot.slane %v971_v17, 2  ;;  %v853_v29 = vmax.f32 %v669_v8, 0.0  ;;  %v855_v30 = vmax.f32 %v782_v18, 0.0 }
 0x12a   : > { %v952_v31 = vadd.f32 %v951_v21, %v950_v1  ;;  %v966_v32 = vadd.f32 %v965_v22, %v964_v13  ;;  %v671_v33 = vadd.f32 %v670_v43, %v2168_v39  ;;  %v784_v34 = vadd.f32 %v783_v44, %v2170_v40 }
 0x12b   : > { %v959_v35 = vadd.f32 %v958_v27, %v957_v7  ;;  %v973_v36 = vadd.f32 %v972_v28, %v971_v17  ;;  %v673_v37 = vadd.f32 %v672_v49, %v2172_v41  ;;  %v786_v38 = vadd.f32 %v785_v50, %v2174_v42 }
 0x12c   : > { %v953_v45 = vrot.slane %v952_v31, 1  ;;  %v967_v46 = vrot.slane %v966_v32, 1  ;;  %v856_v47 = vmax.f32 %v671_v33, 0.0  ;;  %v858_v48 = vmax.f32 %v784_v34, 0.0 }
 0x12d   : > { %v960_v51 = vrot.slane %v959_v35, 1  ;;  %v974_v52 = vrot.slane %v973_v36, 1  ;;  %v857_v53 = vmax.f32 %v673_v37, 0.0  ;;  %v859_v54 = vmax.f32 %v786_v38, 0.0  ;;  %v2232_v55 = vpop.f32.mrb[20].mxu0  ;;  %v2234_v56 = vpop.f32.mrb[20].mxu1 }
 0x12e   : > { %v954_v43 = vadd.f32 %v953_v45, %v952_v31  ;;  %v968_v44 = vadd.f32 %v967_v46, %v966_v32  ;;  %v976_v57 = vadd.f32 %v856_v47, %v852_v23  ;;  %v990_v58 = vadd.f32 %v858_v48, %v854_v24  ;;  %v2236_v59 = vpop.f32.mrb[21].mxu0  ;;  %v2238_v49 = vpop.f32.mrb[21].mxu1 }
 0x12f   : > { %v2240_v50 = vadd.f32 %v960_v51, %v959_v35  ;;  %v2242_v60 = vadd.f32 %v974_v52, %v973_v36  ;;  %v983_v61 = vadd.f32 %v857_v53, %v853_v29  ;;  %v997_v62 = vadd.f32 %v859_v54, %v855_v30  ;;  %v2244_v3 = vpop.f32.mrb[22].mxu0  ;;  %v2246_v4 = vpop.f32.mrb[22].mxu1 }
 0x130   : > { %v1215_v9 = vsel %vm1214_vm3, %v954_v43, %v2201_v63  ;;  %v1234_v10 = vsel %vm1214_vm3, %v968_v44, %v2204_v0  ;;  %v977_v1 = vrot.slane %v976_v57, 4  ;;  %v991_v13 = vrot.slane %v990_v58, 4  ;;  %v2252_v2 = vpop.f32.mrb[23].mxu0  ;;  %v2254_v14 = vpop.f32.mrb[23].mxu1 }
 0x131   : > { %v984_v7 = vrot.slane %v983_v61, 4  ;;  %v998_v17 = vrot.slane %v997_v62, 4  ;;  %v677_v8 = vadd.f32 %v2212_v11, %v2168_v39  ;;  %v790_v18 = vadd.f32 %v2214_v12, %v2170_v40 }
 0x132   : > { %v978_v21 = vadd.f32 %v977_v1, %v976_v57  ;;  %v992_v63 = vadd.f32 %v991_v13, %v990_v58  ;;  %v679_v22 = vadd.f32 %v678_v15, %v2172_v41  ;;  %v792_v0 = vadd.f32 %v791_v16, %v2174_v42 }
 0x133   : > { %v985_v23 = vadd.f32 %v984_v7, %v983_v61  ;;  %v999_v24 = vadd.f32 %v998_v17, %v997_v62  ;;  %v860_v27 = vmax.f32 %v677_v8, 0.0  ;;  %v862_v28 = vmax.f32 %v790_v18, 0.0 }
 0x134   : > { %v979_v29 = vrot.slane %v978_v21, 2  ;;  %v993_v30 = vrot.slane %v992_v63, 2  ;;  %v861_v31 = vmax.f32 %v679_v22, 0.0  ;;  %v863_v32 = vmax.f32 %v792_v0, 0.0 }
 0x135   : > { %v986_v33 = vrot.slane %v985_v23, 2  ;;  %v1000_v34 = vrot.slane %v999_v24, 2  ;;  %v681_v11 = vadd.f32 %v2220_v19, %v2168_v39  ;;  %v794_v12 = vadd.f32 %v2222_v20, %v2170_v40  ;;  %v2266_v35 = vpop.f32.mrb[24].mxu0  ;;  %v2268_v15 = vpop.f32.mrb[24].mxu1 }
 0x136   : > { %v980_v16 = vadd.f32 %v979_v29, %v978_v21  ;;  %v994_v36 = vadd.f32 %v993_v30, %v992_v63  ;;  %v683_v37 = vadd.f32 %v2224_v25, %v2172_v41  ;;  %v796_v38 = vadd.f32 %v2226_v26, %v2174_v42  ;;  %v2274_v45 = vpop.f32.mrb[25].mxu0  ;;  %v2276_v46 = vpop.f32.mrb[25].mxu1 }
 0x137   : > { %v987_v19 = vadd.f32 %v986_v33, %v985_v23  ;;  %v1001_v47 = vadd.f32 %v1000_v34, %v999_v24  ;;  %v864_v48 = vmax.f32 %v681_v11, 0.0  ;;  %v866_v20 = vmax.f32 %v794_v12, 0.0  ;;  %v2278_v51 = vpop.f32.mrb[26].mxu0  ;;  %v2280_v52 = vpop.f32.mrb[26].mxu1 }
 0x138   : > { %v981_v53 = vrot.slane %v980_v16, 1  ;;  %v995_v54 = vrot.slane %v994_v36, 1  ;;  %v865_v43 = vmax.f32 %v683_v37, 0.0  ;;  %v867_v44 = vmax.f32 %v796_v38, 0.0  ;;  %v2282_v25 = vpop.f32.mrb[27].mxu0  ;;  %v2284_v57 = vpop.f32.mrb[27].mxu1 }
 0x139   : > { %v988_v26 = vrot.slane %v987_v19, 1  ;;  %v1002_v58 = vrot.slane %v1001_v47, 1  ;;  %v1004_v61 = vadd.f32 %v864_v48, %v860_v27  ;;  %v1018_v62 = vadd.f32 %v866_v20, %v862_v28 }
 0x13a   : > { %v982_v1 = vadd.f32 %v981_v53, %v980_v16  ;;  %v996_v13 = vadd.f32 %v995_v54, %v994_v36  ;;  %v1011_v7 = vadd.f32 %v865_v43, %v861_v31  ;;  %v1025_v17 = vadd.f32 %v867_v44, %v863_v32 }
 0x13b   : > { %v2286_v8 = vadd.f32 %v988_v26, %v987_v19  ;;  %v2288_v18 = vadd.f32 %v1002_v58, %v1001_v47  ;;  %v1005_v21 = vrot.slane %v1004_v61, 4  ;;  %v1019_v63 = vrot.slane %v1018_v62, 4 }
 0x13c   : > { %v2291_v22 = vsel %vm1216_vm4, %v982_v1, %v1215_v9  ;;  %v2294_v0 = vsel %vm1216_vm4, %v996_v13, %v1234_v10  ;;  %v1012_v23 = vrot.slane %v1011_v7, 4  ;;  %v1026_v24 = vrot.slane %v1025_v17, 4 }
 0x13d   : > { %v1006_v27 = vadd.f32 %v1005_v21, %v1004_v61  ;;  %v1020_v28 = vadd.f32 %v1019_v63, %v1018_v62  ;;  %v687_v29 = vadd.f32 %v2232_v55, %v2168_v39  ;;  %v800_v30 = vadd.f32 %v2234_v56, %v2170_v40  ;;  %v2300_v31 = vpop.f32.mrb[28].mxu0  ;;  %v2302_v32 = vpop.f32.mrb[28].mxu1 }
 0x13e   : > { %v1013_v33 = vadd.f32 %v1012_v23, %v1011_v7  ;;  %v1027_v9 = vadd.f32 %v1026_v24, %v1025_v17  ;;  %v689_v10 = vadd.f32 %v2236_v59, %v2172_v41  ;;  %v802_v34 = vadd.f32 %v2238_v49, %v2174_v42  ;;  %v2308_v11 = vpop.f32.mrb[29].mxu0  ;;  %v2310_v12 = vpop.f32.mrb[29].mxu1 }
 0x13f   : > { %v1007_v55 = vrot.slane %v1006_v27, 2  ;;  %v1021_v16 = vrot.slane %v1020_v28, 2  ;;  %v868_v36 = vmax.f32 %v687_v29, 0.0  ;;  %v870_v56 = vmax.f32 %v800_v30, 0.0  ;;  %v2312_v37 = vpop.f32.mrb[30].mxu0  ;;  %v2314_v38 = vpop.f32.mrb[30].mxu1 }
 0x140   : > { %v1014_v19 = vrot.slane %v1013_v33, 2  ;;  %v1028_v47 = vrot.slane %v1027_v9, 2  ;;  %v869_v48 = vmax.f32 %v689_v10, 0.0  ;;  %v871_v20 = vmax.f32 %v802_v34, 0.0  ;;  %v2316_v59 = vpop.f32.mrb[31].mxu0  ;;  %v2318_v53 = vpop.f32.mrb[31].mxu1 }
 0x141   : > { %v1008_v49 = vadd.f32 %v1007_v55, %v1006_v27  ;;  %v1022_v54 = vadd.f32 %v1021_v16, %v1020_v28  ;;  %v691_v43 = vadd.f32 %v2244_v3, %v2168_v39  ;;  %v804_v44 = vadd.f32 %v2246_v4, %v2170_v40 }
 0x142   : > { %v1015_v26 = vadd.f32 %v1014_v19, %v1013_v33  ;;  %v1029_v58 = vadd.f32 %v1028_v47, %v1027_v9  ;;  %v693_v61 = vadd.f32 %v2252_v2, %v2172_v41  ;;  %v806_v62 = vadd.f32 %v2254_v14, %v2174_v42 }
 0x143   : > { %v1009_v1 = vrot.slane %v1008_v49, 1  ;;  %v1023_v13 = vrot.slane %v1022_v54, 1  ;;  %v872_v7 = vmax.f32 %v691_v43, 0.0  ;;  %v874_v17 = vmax.f32 %v804_v44, 0.0 }
 0x144   : > { %v1016_v21 = vrot.slane %v1015_v26, 1  ;;  %v1030_v63 = vrot.slane %v1029_v58, 1  ;;  %v873_v23 = vmax.f32 %v693_v61, 0.0  ;;  %v875_v24 = vmax.f32 %v806_v62, 0.0 }
 0x145   : > { %v2328_v3 = vadd.f32 %v1009_v1, %v1008_v49  ;;  %v2330_v27 = vadd.f32 %v1023_v13, %v1022_v54  ;;  %v1032_v4 = vadd.f32 %v872_v7, %v868_v36  ;;  %v1046_v28 = vadd.f32 %v874_v17, %v870_v56 }
 0x146   : > { %v2332_v29 = vadd.f32 %v1016_v21, %v1015_v26  ;;  %v2334_v2 = vadd.f32 %v1030_v63, %v1029_v58  ;;  %v1039_v30 = vadd.f32 %v873_v23, %v869_v48  ;;  %v1053_v14 = vadd.f32 %v875_v24, %v871_v20 }
 0x147   : > { %v1033_v33 = vrot.slane %v1032_v4, 4  ;;  %v1047_v9 = vrot.slane %v1046_v28, 4  ;;  %v697_v10 = vadd.f32 %v2266_v35, %v2168_v39  ;;  %v810_v34 = vadd.f32 %v2268_v15, %v2170_v40 }
 0x148   : > { %v1040_v55 = vrot.slane %v1039_v30, 4  ;;  %v1054_v16 = vrot.slane %v1053_v14, 4  ;;  %v699_v36 = vadd.f32 %v2274_v45, %v2172_v41  ;;  %v812_v56 = vadd.f32 %v2276_v46, %v2174_v42 }
 0x149   : > { %v1034_v19 = vadd.f32 %v1033_v33, %v1032_v4  ;;  %v1048_v47 = vadd.f32 %v1047_v9, %v1046_v28  ;;  %v876_v48 = vmax.f32 %v697_v10, 0.0  ;;  %v878_v20 = vmax.f32 %v810_v34, 0.0 }
 0x14a   : > { %v1041_v49 = vadd.f32 %v1040_v55, %v1039_v30  ;;  %v1055_v54 = vadd.f32 %v1054_v16, %v1053_v14  ;;  %v877_v43 = vmax.f32 %v699_v36, 0.0  ;;  %v879_v44 = vmax.f32 %v812_v56, 0.0 }
 0x14b   : > { %v1035_v35 = vrot.slane %v1034_v19, 2  ;;  %v1049_v26 = vrot.slane %v1048_v47, 2  ;;  %v701_v15 = vadd.f32 %v2278_v51, %v2168_v39  ;;  %v814_v58 = vadd.f32 %v2280_v52, %v2170_v40 }
 0x14c   : > { %v1042_v45 = vrot.slane %v1041_v49, 2  ;;  %v1056_v61 = vrot.slane %v1055_v54, 2  ;;  %v703_v46 = vadd.f32 %v2282_v25, %v2172_v41  ;;  %v816_v62 = vadd.f32 %v2284_v57, %v2174_v42 }
 0x14d   : > { %v1036_v1 = vadd.f32 %v1035_v35, %v1034_v19  ;;  %v1050_v13 = vadd.f32 %v1049_v26, %v1048_v47  ;;  %v880_v7 = vmax.f32 %v701_v15, 0.0  ;;  %v882_v17 = vmax.f32 %v814_v58, 0.0 }
 0x14e   : > { %v1043_v21 = vadd.f32 %v1042_v45, %v1041_v49  ;;  %v1057_v63 = vadd.f32 %v1056_v61, %v1055_v54  ;;  %v881_v23 = vmax.f32 %v703_v46, 0.0  ;;  %v883_v24 = vmax.f32 %v816_v62, 0.0 }
 0x14f   : > { %v1037_v51 = vrot.slane %v1036_v1, 1  ;;  %v1051_v4 = vrot.slane %v1050_v13, 1  ;;  %v1060_v28 = vadd.f32 %v880_v7, %v876_v48  ;;  %v1074_v52 = vadd.f32 %v882_v17, %v878_v20 }
 0x150   : > { %v1044_v30 = vrot.slane %v1043_v21, 1  ;;  %v1058_v14 = vrot.slane %v1057_v63, 1  ;;  %v1067_v33 = vadd.f32 %v881_v23, %v877_v43  ;;  %v1081_v9 = vadd.f32 %v883_v24, %v879_v44 }
 0x151   : > { %v2352_v25 = vadd.f32 %v1037_v51, %v1036_v1  ;;  %v2354_v10 = vadd.f32 %v1051_v4, %v1050_v13  ;;  %v1061_v57 = vrot.slane %v1060_v28, 4  ;;  %v1075_v34 = vrot.slane %v1074_v52, 4 }
 0x152   : > { %v1045_v55 = vadd.f32 %v1044_v30, %v1043_v21  ;;  %v2356_v16 = vadd.f32 %v1058_v14, %v1057_v63  ;;  %v1068_v36 = vrot.slane %v1067_v33, 4  ;;  %v1082_v56 = vrot.slane %v1081_v9, 4 }
 0x153   : > { %v1062_v19 = vadd.f32 %v1061_v57, %v1060_v28  ;;  %v1076_v47 = vadd.f32 %v1075_v34, %v1074_v52  ;;  %v707_v48 = vadd.f32 %v2300_v31, %v2168_v39  ;;  %v820_v20 = vadd.f32 %v2302_v32, %v2170_v40 }
 0x154   : > { %v1069_v49 = vadd.f32 %v1068_v36, %v1067_v33  ;;  %v1083_v54 = vadd.f32 %v1082_v56, %v1081_v9  ;;  %v709_v43 = vadd.f32 %v2308_v11, %v2172_v41  ;;  %v822_v44 = vadd.f32 %v2310_v12, %v2174_v42 }
 0x155   : > { %v1063_v35 = vrot.slane %v1062_v19, 2  ;;  %v1077_v26 = vrot.slane %v1076_v47, 2  ;;  %v884_v15 = vmax.f32 %v707_v48, 0.0  ;;  %v886_v58 = vmax.f32 %v820_v20, 0.0 }
 0x156   : > { %v1070_v45 = vrot.slane %v1069_v49, 2  ;;  %v1084_v31 = vrot.slane %v1083_v54, 2  ;;  %v885_v61 = vmax.f32 %v709_v43, 0.0  ;;  %v887_v46 = vmax.f32 %v822_v44, 0.0 }
 0x157   : > { %v1064_v32 = vadd.f32 %v1063_v35, %v1062_v19  ;;  %v1078_v62 = vadd.f32 %v1077_v26, %v1076_v47  ;;  %v711_v1 = vadd.f32 %v2312_v37, %v2168_v39  ;;  %v824_v11 = vadd.f32 %v2314_v38, %v2170_v40 }
 0x158   : > { %v1071_v13 = vadd.f32 %v1070_v45, %v1069_v49  ;;  %v1085_v12 = vadd.f32 %v1084_v31, %v1083_v54  ;;  %v713_v7 = vadd.f32 %v2316_v59, %v2172_v41  ;;  %v826_v17 = vadd.f32 %v2318_v53, %v2174_v42 }
 0x159   : > { %v1065_v21 = vrot.slane %v1064_v32, 1  ;;  %v1079_v63 = vrot.slane %v1078_v62, 1  ;;  %v888_v23 = vmax.f32 %v711_v1, 0.0  ;;  %v890_v24 = vmax.f32 %v824_v11, 0.0 }
 0x15a   : > { %v1072_v51 = vrot.slane %v1071_v13, 1  ;;  %v1086_v4 = vrot.slane %v1085_v12, 1  ;;  %v889_v28 = vmax.f32 %v713_v7, 0.0  ;;  %v891_v52 = vmax.f32 %v826_v17, 0.0 }
 0x15b   : > { %v1066_v39 = vadd.f32 %v1065_v21, %v1064_v32  ;;  %v1080_v37 = vadd.f32 %v1079_v63, %v1078_v62  ;;  %v1088_v30 = vadd.f32 %v888_v23, %v884_v15  ;;  %v1102_v40 = vadd.f32 %v890_v24, %v886_v58 }
 0x15c   : > { %v1095_v38 = vadd.f32 %v889_v28, %v885_v61  ;;  %v1109_v14 = vadd.f32 %v891_v52, %v887_v46  ;;  %v1073_v33 = vadd.f32 %v1072_v51, %v1071_v13  ;;  %v1227_v41 = vsel %vm1214_vm3, %v2240_v50, %v2207_v5 }
 0x15d   : > { %v1089_v42 = vrot.slane %v1088_v30, 4  ;;  %v1103_v59 = vrot.slane %v1102_v40, 4  ;;  %v1228_v53 = vsel %vm1216_vm4, %v2286_v8, %v1227_v41  ;;  %v1087_v9 = vadd.f32 %v1086_v4, %v1085_v12 }
 0x15e   : > { %v1096_v57 = vrot.slane %v1095_v38, 4  ;;  %v1110_v34 = vrot.slane %v1109_v14, 4  ;;  %v1229_v36 = vsel %vm1218_vm5, %v2332_v29, %v1228_v53  ;;  %v1241_v56 = vsel %vm1214_vm3, %v2242_v60, %v2210_v6 }
 0x15f   : > { %v1090_v19 = vadd.f32 %v1089_v42, %v1088_v30  ;;  %v1104_v47 = vadd.f32 %v1103_v59, %v1102_v40  ;;  %v1230_v48 = vsel %vm1220_vm6, %v1045_v55, %v1229_v36  ;;  %v1242_v5 = vsel %vm1216_vm4, %v2288_v18, %v1241_v56 }
 0x160   : > { %v1097_v50 = vadd.f32 %v1096_v57, %v1095_v38  ;;  %v1111_v20 = vadd.f32 %v1110_v34, %v1109_v14  ;;  %v1231_v8 = vsel %vm1222_vm7, %v1073_v33, %v1230_v48  ;;  %v1243_v49 = vsel %vm1218_vm5, %v2334_v2, %v1242_v5 }
 0x161   : > { %v1091_v54 = vrot.slane %v1090_v19, 2  ;;  %v1105_v29 = vrot.slane %v1104_v47, 2  ;;  %v1244_v43 = vsel %vm1220_vm6, %v2356_v16, %v1243_v49  ;;  %v1219_v6 = vsel %vm1218_vm5, %v2328_v3, %v2291_v22 }
 0x162   : > { %v1098_v60 = vrot.slane %v1097_v50, 2  ;;  %v1112_v55 = vrot.slane %v1111_v20, 2  ;;  %v1245_v18 = vsel %vm1222_vm7, %v1087_v9, %v1244_v43  ;;  %v1221_v44 = vsel %vm1220_vm6, %v2352_v25, %v1219_v6 }
 0x163   : > { %v1092_v35 = vadd.f32 %v1091_v54, %v1090_v19  ;;  %v1106_v26 = vadd.f32 %v1105_v29, %v1104_v47  ;;  %v1223_v2 = vsel %vm1222_vm7, %v1066_v39, %v1221_v44  ;;  %v1236_v15 = vsel %vm1218_vm5, %v2330_v27, %v2294_v0 }
 0x164   : > { %v1099_v16 = vadd.f32 %v1098_v60, %v1097_v50  ;;  %v1113_v58 = vadd.f32 %v1112_v55, %v1111_v20  ;;  %v1237_v22 = vsel %vm1220_vm6, %v2354_v10, %v1236_v15 }
 0x165   : > { %v1093_v3 = vrot.slane %v1092_v35, 1  ;;  %v1107_v45 = vrot.slane %v1106_v26, 1  ;;  %v1238_v31 = vsel %vm1222_vm7, %v1080_v37, %v1237_v22 }
 0x166   : > { %v1100_v61 = vrot.slane %v1099_v16, 1  ;;  %v1114_v25 = vrot.slane %v1113_v58, 1 }
 0x167   : > { %v1094_v46 = vadd.f32 %v1093_v3, %v1092_v35  ;;  %v1108_v32 = vadd.f32 %v1107_v45, %v1106_v26 }
 0x168   : > { %v1101_v62 = vadd.f32 %v1100_v61, %v1099_v16  ;;  %v1115_v1 = vadd.f32 %v1114_v25, %v1113_v58 }
 0x169   : > { %v1225_v11 = vsel %vm1224_vm8, %v1094_v46, %v1223_v2  ;;  %v1239_v0 = vsel %vm1224_vm8, %v1108_v32, %v1238_v31 }
 0x16a   : > { %v1232_v27 = vsel %vm1224_vm8, %v1101_v62, %v1231_v8  ;;  %v1246_v13 = vsel %vm1224_vm8, %v1115_v1, %v1245_v18 }
 0x16b   : > { %1315 = vmatprep.mubr.f32.mxu0 %v1232_v27  ;;  %1385 = vmatprep.mubr.f32.mxu1 %v1246_v13 }
 0x16c   : > { %1316 = vmatmul.mubr.f32.vlgmr.msra.gmra.mrb[32].mxu0 %v1225_v11  ;;  %1386 = vmatmul.mubr.f32.vlgmr.msra.gmra.mrb[32].mxu1 %v1239_v0 }
 0x23f   : > { %v1568_v10 = vpop.f32.mrb[32].mxu0  ;;  %v1603_v12 = vpop.f32.mrb[32].mxu1 }
 0x240   : > { %v1569_v7 = vpop.f32.mrb[33].mxu0  ;;  %v1604_v17 = vpop.f32.mrb[33].mxu1 }
 0x241   : > { %v1570_v21 = vadd.f32 %v1569_v7, %v1568_v10  ;;  %v1605_v63 = vadd.f32 %v1604_v17, %v1603_v12 }
 0x243   : > { %v1388_v23 = vadd.f32 %v1605_v63, %v1570_v21 }
 0x245   : > { %1392 = vst.msk [vmem:[%s200_s24] sm:$0xff] %vm1391_vm9, %v1388_v23 }
 0x246 PF: > { %s14_s15 = sadd.s32 1, %s1772_s15  }
 0x247   : > { %p11_p5 = scmp.ge.s32.totalorder %s14_s15, 4  }
 0x249   :  { %13 = sbr.rel (!%p11_p5) target bundleno = 1 (0x1), region = 66 }

</bundles_post_ra>
